<compile_context>
chip_gen: v6e
topology: v6e:2x2x1
jax: 0.10.0
libtpu: 0.0.40
codegen_flags: <defaults>
</compile_context>

<pallas_src>
import numpy as np
import jax
import jax.numpy as jnp
from jax import lax
from jax.experimental import pallas as pl
from jax.experimental.pallas import tpu as pltpu

# ---------------- "args" of the PyTorch module (small, deterministic) --------
IMAGE_SIZE = 16          # args.image_size
HIDDEN = 32              # args.hidden_size
LSTM = 32                # args.lstm_size
ENCODE = 16              # args.encode_size
MIN_SPEED = 0.0          # args.min_speed
MAX_SPEED = 10.0         # args.max_speed
SLOPE = 0.01             # nn.LeakyReLU default negative_slope
CIN, COUT = 4, 16        # conv in/out channels

H = W = IMAGE_SIZE
HP, WP = H // 2, W // 2
WC = W * COUT            # 256: lane-dense conv-row width (w-major, c-minor)
KP = (W + 2) * CIN       # 72: im2col lanes contributed per kh tap
KIM = 256                # im2col K, zero-padded 3*KP=216 -> 256
GK = 4 * HIDDEN          # 128: gate-matmul K, zero-padded 3*HIDDEN -> 128

# pslab row layout (128 lanes wide, one DMA for all small head params)
PS_WIH = 0                   # rows 0..127 : packed W_ih (96 real + 32 zero rows)
PS_BG = GK                   # row 128     : packed b_ih + b_hh (i|f|g|o)
PS_MISC = PS_BG + 1          # row 129     : img_b | sp_b | pa_b | sp_w (4 x 32)
PS_PAW = PS_MISC + 1         # rows 130,131: pa_w (lanes 0:32); enc_b1/enc_b2 (32:)
PS_ENCW = 136                # rows 136..167: enc_w1 (lanes 0:32) | enc_w2 (32:48)
PS_ROWS = PS_ENCW + LSTM     # 168

VMEM = pltpu.MemorySpace.VMEM
# finite stand-in for PyTorch's implicit -inf pool padding; a padded slot is
# never the only element of a window for this (k=3, s=2, p=1, even-dim) config.
NEG = -3.0e38


def _lrelu(v):
    return jnp.where(v > 0, v, SLOPE * v)


# ------------------------------ fused Pallas kernel ---------------------------
def summarizer_kernel(x_ref, speed_ref, pa_ref, conv_wb_ref, img_w_ref,
                      pslab_ref, out_ref):
    f32 = jnp.float32
    B = x_ref.shape[0]

    # ---- image_in_1: reflect pad + ConstrainedConv2d(4->16, 3x3) ------------
    # x lanes are (w, ci) merged, so a column shift is a 4-lane shift.
    x = x_ref[...]                                                 # (B, H, W*CIN)
    xw = jnp.concatenate(                                          # reflect pad W
        [x[:, :, CIN:2 * CIN], x, x[:, :, (W - 2) * CIN:(W - 1) * CIN]], axis=-1)
    xh = jnp.concatenate(                                          # reflect pad H
        [xw[:, 1:2, :], xw, xw[:, H - 2:H - 1, :]], axis=1)        # (B, H+2, 72)

    # im2col: lanes [kh=0 | kh=1 | kh=2 | zero pad] -> ONE MXU matmul whose
    # output is already lane-dense (B*H, W*COUT).
    lhs = jnp.concatenate(
        [xh[:, 0:H, :], xh[:, 1:H + 1, :], xh[:, 2:H + 2, :],
         jnp.zeros((B, H, KIM - 3 * KP), f32)], axis=-1).reshape(B * H, KIM)
    y = jnp.dot(lhs, conv_wb_ref[0:KIM, :], preferred_element_type=f32)
    y = _lrelu(y + conv_wb_ref[KIM:KIM + 1, :])                    # (B*H, 256)

    # ---- MaxPool2d(3, stride 2, pad 1) ---------------------------------------
    # H pass: rows {2p-1, 2p, 2p+1} via even/odd row pairing (all lane-dense).
    y4 = y.reshape(B, HP, 2, WC)
    h_even, h_odd = y4[:, :, 0, :], y4[:, :, 1, :]
    h_prev = jnp.concatenate(
        [jnp.full((B, 1, WC), NEG, f32), h_odd[:, :HP - 1, :]], axis=1)
    ph = jnp.maximum(jnp.maximum(h_even, h_odd), h_prev)           # (B, HP, 256)

    # W pass: full-resolution column max via +-16-lane shifts; the stride-2
    # subsample is folded into img_w (zero rows at odd w), keeping lane density.
    pad = jnp.full((B, HP, COUT), NEG, f32)
    left = jnp.concatenate([pad, ph[:, :, :WC - COUT]], axis=-1)
    right = jnp.concatenate([ph[:, :, COUT:], pad], axis=-1)
    wmax = jnp.maximum(jnp.maximum(ph, left), right)               # (B, HP, 256)

    feat = jnp.concatenate([wmax[:, hp, :] for hp in range(HP)], axis=-1)  # (B,2048)

    # ---- image_in_2 / speed_in / prev_action_in ------------------------------
    misc = pslab_ref[PS_MISC:PS_MISC + 1, :]
    img_b, sp_b = misc[:, 0:HIDDEN], misc[:, HIDDEN:2 * HIDDEN]
    pa_b, sp_w = misc[:, 2 * HIDDEN:3 * HIDDEN], misc[:, 3 * HIDDEN:4 * HIDDEN]

    img_h = _lrelu(jnp.dot(feat, img_w_ref[...], preferred_element_type=f32) + img_b)

    sp = (speed_ref[...] - MIN_SPEED) / (MAX_SPEED - MIN_SPEED) * 2.0 - 1.0
    sp_h = _lrelu(sp * sp_w + sp_b)                                # VPU broadcast FMA

    pa = pa_ref[...]
    paw = pslab_ref[PS_PAW:PS_PAW + 2, :]
    pa_w = paw[:, 0:HIDDEN]
    enc_b1 = paw[0:1, HIDDEN:2 * HIDDEN]
    enc_b2 = paw[1:2, HIDDEN:HIDDEN + ENCODE]
    pa_h = _lrelu(pa[:, 0:1] * pa_w[0:1, :] + pa[:, 1:2] * pa_w[1:2, :] + pa_b)

    # ---- LSTM step (hidden=None path): ONE packed lane-dense gate matmul -----
    xcat = jnp.concatenate(
        [img_h, sp_h, pa_h, jnp.zeros((B, GK - 3 * HIDDEN), f32)], axis=-1)  # (B,128)
    gates = (jnp.dot(xcat, pslab_ref[PS_WIH:PS_WIH + GK, :],
                     preferred_element_type=f32)
             + pslab_ref[PS_BG:PS_BG + 1, :])                                 # (B,128)
    i = jax.nn.sigmoid(gates[:, 0:LSTM])
    g = jnp.tanh(gates[:, 2 * LSTM:3 * LSTM])
    o = jax.nn.sigmoid(gates[:, 3 * LSTM:4 * LSTM])
    # TODO(synk): f-gate*c0 and h0@W_hh dropped; only the hidden=None,
    # single-step path is implemented, where h0 = c0 = 0.
    c1 = i * g
    h1 = o * jnp.tanh(c1)

    # ---- encode MLP -----------------------------------------------------------
    encw = pslab_ref[PS_ENCW:PS_ENCW + LSTM, :]
    z = _lrelu(h1)
    z = _lrelu(jnp.dot(z, encw[:, 0:HIDDEN], preferred_element_type=f32) + enc_b1)
    z = _lrelu(jnp.dot(z, encw[:, HIDDEN:HIDDEN + ENCODE],
                       preferred_element_type=f32) + enc_b2)

    # single unmasked 128-lane store: [enc | h1 | c1 | zero pad]
    out_ref[...] = jnp.concatenate(
        [z, h1, c1, jnp.zeros((B, 128 - ENCODE - 2 * LSTM), f32)], axis=-1)


# ------------------------------ pallas_call wrapper ---------------------------
def summarizer_forward(prep, image, speed, prev_action):
    B = image.shape[0]
    img3 = image.astype(jnp.float32).reshape(B, H, W * CIN)   # free contiguous reshape
    out = pl.pallas_call(
        summarizer_kernel,
        out_shape=jax.ShapeDtypeStruct((B, 128), jnp.float32),
        in_specs=[pl.BlockSpec(memory_space=VMEM)] * 6,
        out_specs=pl.BlockSpec(memory_space=VMEM),
    )(img3, speed.astype(jnp.float32), prev_action.astype(jnp.float32),
      prep['conv_wb'], prep['img_w2'], prep['pslab'])
    enc = out[:, :ENCODE]
    h1 = out[:, ENCODE:ENCODE + LSTM]
    c1 = out[:, ENCODE + LSTM:ENCODE + 2 * LSTM]
    return enc, (h1[None], c1[None])   # hidden = (h_n, c_n): (1, B, LSTM)


# -------------------- one-time parameter preparation (outside jit) ------------
def prepare_params(p):
    """Re-layout PyTorch-style parameters into three kernel slabs (done once)."""
    f32 = np.float32

    # conv: ConstrainedConv2d clamps weight to [-1,1]; pack as an im2col weight
    # whose matmul emits a lane-dense (B*H, W*COUT) conv output directly.
    w = np.clip(np.asarray(p['conv_w_oihw'], f32), -1.0, 1.0)     # (cout, cin, kh, kw)
    cw = np.zeros((3, KP, WC), f32)
    for kh in range(3):
        for kw in range(3):
            blk = w[:, :, kh, kw].T                               # (cin, cout)
            for wo in range(W):
                pc = wo + kw                                      # padded input column
                cw[kh, pc * CIN:(pc + 1) * CIN, wo * COUT:(wo + 1) * COUT] = blk
    cw = cw.reshape(3 * KP, WC)
    cw = np.concatenate([cw, np.zeros((KIM - 3 * KP, WC), f32)], axis=0)
    b_row = np.tile(np.asarray(p['conv_b'], f32).reshape(COUT), W)[None, :]
    conv_wb = np.concatenate([cw, b_row], axis=0)                 # (257, 256)

    # image_in_2: permute rows from NCHW-flatten order to the kernel's
    # (hp, w, c) lane order and fold the stride-2 W subsample in as zero rows.
    iw = np.asarray(p['img_w'], f32).reshape(COUT, HP, WP, HIDDEN)
    img_w2 = np.zeros((HP, W, COUT, HIDDEN), f32)
    img_w2[:, 0::2, :, :] = np.transpose(iw, (1, 2, 0, 3))
    img_w2 = img_w2.reshape(HP * W * COUT, HIDDEN)                # (2048, 32)

    # everything else: one (PS_ROWS, 128) slab -> a single small DMA.
    ps = np.zeros((PS_ROWS, 128), f32)
    wih = np.concatenate([np.asarray(p['wih'][k], f32) for k in range(4)], axis=1)
    bg = np.concatenate([np.asarray(p['bg'][k], f32) for k in range(4)], axis=1)
    ps[0:3 * HIDDEN, :] = wih                                     # rows 96:128 stay 0
    ps[PS_BG, :] = bg[0]
    ps[PS_MISC, 0:HIDDEN] = np.asarray(p['img_b'], f32)[0]
    ps[PS_MISC, HIDDEN:2 * HIDDEN] = np.asarray(p['sp_b'], f32)[0]
    ps[PS_MISC, 2 * HIDDEN:3 * HIDDEN] = np.asarray(p['pa_b'], f32)[0]
    ps[PS_MISC, 3 * HIDDEN:4 * HIDDEN] = np.asarray(p['sp_w'], f32)[0]
    ps[PS_PAW:PS_PAW + 2, 0:HIDDEN] = np.asarray(p['pa_w'], f32)
    ps[PS_PAW, HIDDEN:2 * HIDDEN] = np.asarray(p['enc_b1'], f32)[0]
    ps[PS_PAW + 1, HIDDEN:HIDDEN + ENCODE] = np.asarray(p['enc_b2'], f32)[0]
    ps[PS_ENCW:PS_ENCW + LSTM, 0:HIDDEN] = np.asarray(p['enc_w1'], f32)
    ps[PS_ENCW:PS_ENCW + LSTM, HIDDEN:HIDDEN + ENCODE] = np.asarray(p['enc_w2'], f32)

    return dict(conv_wb=jnp.asarray(conv_wb), img_w2=jnp.asarray(img_w2),
                pslab=jnp.asarray(ps))


# ----------------------- deterministic parameter init -------------------------
def init_params(key):
    ks = jax.random.split(key, 16)

    def u(k, shape, scale):
        return scale * jax.random.uniform(k, shape, jnp.float32, -1.0, 1.0)

    flat = COUT * HP * WP   # 16 * 8 * 8 = 1024
    return dict(
        conv_w_oihw=u(ks[0], (COUT, CIN, 3, 3), 0.2),
        conv_b=u(ks[1], (1, COUT), 0.1),
        img_w=u(ks[2], (flat, HIDDEN), 0.05),
        img_b=u(ks[3], (1, HIDDEN), 0.05),
        sp_w=u(ks[4], (1, HIDDEN), 0.5),
        sp_b=u(ks[5], (1, HIDDEN), 0.1),
        pa_w=u(ks[6], (2, HIDDEN), 0.5),
        pa_b=u(ks[7], (1, HIDDEN), 0.1),
        wih=u(ks[8], (4, 3 * HIDDEN, LSTM), 0.1),   # gates (i, f, g, o), x -> gate
        whh=u(ks[9], (4, LSTM, LSTM), 0.1),         # gates (i, f, g, o), h -> gate
        bg=u(ks[10], (4, 1, LSTM), 0.1),            # b_ih + b_hh combined, per gate
        enc_w1=u(ks[11], (LSTM, HIDDEN), 0.2),
        enc_b1=u(ks[12], (1, HIDDEN), 0.1),
        enc_w2=u(ks[13], (HIDDEN, ENCODE), 0.2),
        enc_b2=u(ks[14], (1, ENCODE), 0.1),
    )


# ------------------------------ pure-JAX reference ----------------------------
def reference_forward(params, image, speed, prev_action):
    hp = lax.Precision.HIGHEST
    B = image.shape[0]
    x = jnp.transpose(image.astype(jnp.float32), (0, 3, 1, 2))   # NCHW like PyTorch
    xp = jnp.pad(x, ((0, 0), (0, 0), (1, 1), (1, 1)), mode="reflect")
    w = jnp.clip(params['conv_w_oihw'], -1.0, 1.0)
    y = lax.conv_general_dilated(xp, w, (1, 1), "VALID",
                                 dimension_numbers=("NCHW", "OIHW", "NCHW"),
                                 precision=hp)
    y = _lrelu(y + params['conv_b'].reshape(1, COUT, 1, 1))
    y = lax.reduce_window(y, -jnp.inf, lax.max, (1, 1, 3, 3), (1, 1, 2, 2),
                          ((0, 0), (0, 0), (1, 1), (1, 1)))
    feat = y.reshape(B, -1)

    def lin(v, w_, b_):
        return _lrelu(jnp.dot(v, w_, precision=hp) + b_)

    img_h = lin(feat, params['img_w'], params['img_b'])
    sp = (speed.astype(jnp.float32) - MIN_SPEED) / (MAX_SPEED - MIN_SPEED) * 2.0 - 1.0
    sp_h = lin(sp, params['sp_w'], params['sp_b'])
    pa_h = lin(prev_action.astype(jnp.float32), params['pa_w'], params['pa_b'])
    xc = jnp.concatenate([img_h, sp_h, pa_h], -1)
    h0 = jnp.zeros((B, LSTM), jnp.float32)
    c0 = jnp.zeros((B, LSTM), jnp.float32)

    def gate(k):
        return (jnp.dot(xc, params['wih'][k], precision=hp)
                + jnp.dot(h0, params['whh'][k], precision=hp) + params['bg'][k])

    i = jax.nn.sigmoid(gate(0)); f = jax.nn.sigmoid(gate(1))
    g = jnp.tanh(gate(2)); o = jax.nn.sigmoid(gate(3))
    c1 = f * c0 + i * g
    h1 = o * jnp.tanh(c1)
    z = _lrelu(h1)
    z = lin(z, params['enc_w1'], params['enc_b1'])
    z = lin(z, params['enc_w2'], params['enc_b2'])
    return z, (h1[None], c1[None])


# ----------------------------------- main -------------------------------------
if __name__ == "__main__":
    key = jax.random.PRNGKey(0)
    kp, ki, ksp, ka = jax.random.split(key, 4)
    params = init_params(kp)
    prep = prepare_params(params)          # one-time, outside the hot path

    B = 2
    image = jax.random.uniform(ki, (B, IMAGE_SIZE, IMAGE_SIZE, 4), jnp.float32)
    speed = jax.random.uniform(ksp, (B, 1), jnp.float32, 0.0, MAX_SPEED)
    prev_action = jax.random.uniform(ka, (B, 2), jnp.float32, -1.0, 1.0)

    fwd = jax.jit(summarizer_forward)
    enc, (h1, c1) = fwd(prep, image, speed, prev_action)
    jax.block_until_ready((enc, h1, c1))

    enc_r, (h1_r, c1_r) = reference_forward(params, image, speed, prev_action)
    # 1e-2: kernel matmuls use the MXU's native f32 path while the reference
    # runs at HIGHEST precision; still tight enough that any weight-packing /
    # permutation / gate-order bug (O(0.1) error) would fail the check.
    np.testing.assert_allclose(np.asarray(enc), np.asarray(enc_r), rtol=1e-2, atol=1e-2)
    np.testing.assert_allclose(np.asarray(h1), np.asarray(h1_r), rtol=1e-2, atol=1e-2)
    np.testing.assert_allclose(np.asarray(c1), np.asarray(c1_r), rtol=1e-2, atol=1e-2)

    print("KERNEL_OK")
</pallas_src>

<mosaic_0001>
module attributes {stable_mosaic.version = 11 : i64} {
  func.func @summarizer_kernel(%arg0: memref<2x16x64xf32, #tpu.memory_space<vmem>>, %arg1: memref<2x1xf32, #tpu.memory_space<vmem>>, %arg2: memref<2x2xf32, #tpu.memory_space<vmem>>, %arg3: memref<257x256xf32, #tpu.memory_space<vmem>>, %arg4: memref<2048x32xf32, #tpu.memory_space<vmem>>, %arg5: memref<168x128xf32, #tpu.memory_space<vmem>>, %arg6: memref<2x128xf32, #tpu.memory_space<vmem>>) attributes {dimension_semantics = [], scalar_prefetch = 0 : i64, scratch_operands = 0 : i64, tpu.core_type = #tpu.core_type<tc>} {
    %c0 = arith.constant 0 : index
    %c0_0 = arith.constant 0 : index
    %c0_1 = arith.constant 0 : index
    %0 = vector.load %arg0[%c0, %c0_0, %c0_1] : memref<2x16x64xf32, #tpu.memory_space<vmem>>, vector<2x16x64xf32>
    %1 = vector.extract_strided_slice %0 {offsets = [0, 0, 4], sizes = [2, 16, 4], strides = [1, 1, 1]} : vector<2x16x64xf32> to vector<2x16x4xf32>
    %2 = vector.extract_strided_slice %0 {offsets = [0, 0, 56], sizes = [2, 16, 4], strides = [1, 1, 1]} : vector<2x16x64xf32> to vector<2x16x4xf32>
    %3 = tpu.concatenate %1, %0, %2 in 2 : vector<2x16x4xf32>, vector<2x16x64xf32>, vector<2x16x4xf32> -> vector<2x16x72xf32>
    %4 = vector.extract_strided_slice %3 {offsets = [0, 1, 0], sizes = [2, 1, 72], strides = [1, 1, 1]} : vector<2x16x72xf32> to vector<2x1x72xf32>
    %5 = vector.extract_strided_slice %3 {offsets = [0, 14, 0], sizes = [2, 1, 72], strides = [1, 1, 1]} : vector<2x16x72xf32> to vector<2x1x72xf32>
    %6 = tpu.concatenate %4, %3, %5 in 1 : vector<2x1x72xf32>, vector<2x16x72xf32>, vector<2x1x72xf32> -> vector<2x18x72xf32>
    %7 = vector.extract_strided_slice %6 {offsets = [0, 0, 0], sizes = [2, 16, 72], strides = [1, 1, 1]} : vector<2x18x72xf32> to vector<2x16x72xf32>
    %8 = vector.extract_strided_slice %6 {offsets = [0, 1, 0], sizes = [2, 16, 72], strides = [1, 1, 1]} : vector<2x18x72xf32> to vector<2x16x72xf32>
    %9 = vector.extract_strided_slice %6 {offsets = [0, 2, 0], sizes = [2, 16, 72], strides = [1, 1, 1]} : vector<2x18x72xf32> to vector<2x16x72xf32>
    %cst = arith.constant 0.000000e+00 : f32
    %10 = vector.broadcast %cst : f32 to vector<2x16x40xf32>
    %11 = tpu.concatenate %7, %8, %9, %10 in 2 : vector<2x16x72xf32>, vector<2x16x72xf32>, vector<2x16x72xf32>, vector<2x16x40xf32> -> vector<2x16x256xf32>
    %12 = vector.shape_cast %11 : vector<2x16x256xf32> to vector<32x256xf32>
    %c0_2 = arith.constant 0 : index
    %c0_3 = arith.constant 0 : index
    %13 = vector.load %arg3[%c0_2, %c0_3] : memref<257x256xf32, #tpu.memory_space<vmem>>, vector<256x256xf32>
    %cst_4 = arith.constant dense<0.000000e+00> : vector<32x256xf32>
    %14 = tpu.matmul %12, %13, %cst_4 {dimension_numbers = #tpu.dot_dimension_numbers<[1], [0], [0], [1], [0, 0, 1, 1], [], []>} : vector<32x256xf32>, vector<256x256xf32>, vector<32x256xf32> -> vector<32x256xf32>
    %c256 = arith.constant 256 : index
    %c0_5 = arith.constant 0 : index
    %15 = vector.load %arg3[%c256, %c0_5] : memref<257x256xf32, #tpu.memory_space<vmem>>, vector<1x256xf32>
    %16 = vector.broadcast %15 : vector<1x256xf32> to vector<32x256xf32>
    %17 = arith.addf %14, %16 : vector<32x256xf32>
    %cst_6 = arith.constant 0.000000e+00 : f32
    %18 = vector.broadcast %cst_6 : f32 to vector<32x256xf32>
    %19 = arith.cmpf ogt, %17, %18 : vector<32x256xf32>
    %cst_7 = arith.constant 0.00999999977 : f32
    %20 = vector.broadcast %cst_7 : f32 to vector<32x256xf32>
    %21 = arith.mulf %20, %17 : vector<32x256xf32>
    %22 = arith.select %19, %17, %21 : vector<32x256xi1>, vector<32x256xf32>
    %23 = vector.shape_cast %22 : vector<32x256xf32> to vector<2x8x2x256xf32>
    %24 = vector.extract_strided_slice %23 {offsets = [0, 0, 0, 0], sizes = [2, 8, 1, 256], strides = [1, 1, 1, 1]} : vector<2x8x2x256xf32> to vector<2x8x1x256xf32>
    %25 = vector.shape_cast %24 : vector<2x8x1x256xf32> to vector<2x8x256xf32>
    %26 = vector.extract_strided_slice %23 {offsets = [0, 0, 1, 0], sizes = [2, 8, 1, 256], strides = [1, 1, 1, 1]} : vector<2x8x2x256xf32> to vector<2x8x1x256xf32>
    %27 = vector.shape_cast %26 : vector<2x8x1x256xf32> to vector<2x8x256xf32>
    %cst_8 = arith.constant -3.000000e+38 : f32
    %28 = vector.broadcast %cst_8 : f32 to vector<2x1x256xf32>
    %29 = vector.extract_strided_slice %27 {offsets = [0, 0, 0], sizes = [2, 7, 256], strides = [1, 1, 1]} : vector<2x8x256xf32> to vector<2x7x256xf32>
    %30 = tpu.concatenate %28, %29 in 1 : vector<2x1x256xf32>, vector<2x7x256xf32> -> vector<2x8x256xf32>
    %31 = arith.maximumf %25, %27 : vector<2x8x256xf32>
    %32 = arith.maximumf %31, %30 : vector<2x8x256xf32>
    %cst_9 = arith.constant -3.000000e+38 : f32
    %33 = vector.broadcast %cst_9 : f32 to vector<2x8x16xf32>
    %34 = vector.extract_strided_slice %32 {offsets = [0, 0, 0], sizes = [2, 8, 240], strides = [1, 1, 1]} : vector<2x8x256xf32> to vector<2x8x240xf32>
    %35 = tpu.concatenate %33, %34 in 2 : vector<2x8x16xf32>, vector<2x8x240xf32> -> vector<2x8x256xf32>
    %36 = vector.extract_strided_slice %32 {offsets = [0, 0, 16], sizes = [2, 8, 240], strides = [1, 1, 1]} : vector<2x8x256xf32> to vector<2x8x240xf32>
    %37 = tpu.concatenate %36, %33 in 2 : vector<2x8x240xf32>, vector<2x8x16xf32> -> vector<2x8x256xf32>
    %38 = arith.maximumf %32, %35 : vector<2x8x256xf32>
    %39 = arith.maximumf %38, %37 : vector<2x8x256xf32>
    %40 = vector.extract_strided_slice %39 {offsets = [0, 0, 0], sizes = [2, 1, 256], strides = [1, 1, 1]} : vector<2x8x256xf32> to vector<2x1x256xf32>
    %41 = vector.shape_cast %40 : vector<2x1x256xf32> to vector<2x256xf32>
    %42 = vector.extract_strided_slice %39 {offsets = [0, 1, 0], sizes = [2, 1, 256], strides = [1, 1, 1]} : vector<2x8x256xf32> to vector<2x1x256xf32>
    %43 = vector.shape_cast %42 : vector<2x1x256xf32> to vector<2x256xf32>
    %44 = vector.extract_strided_slice %39 {offsets = [0, 2, 0], sizes = [2, 1, 256], strides = [1, 1, 1]} : vector<2x8x256xf32> to vector<2x1x256xf32>
    %45 = vector.shape_cast %44 : vector<2x1x256xf32> to vector<2x256xf32>
    %46 = vector.extract_strided_slice %39 {offsets = [0, 3, 0], sizes = [2, 1, 256], strides = [1, 1, 1]} : vector<2x8x256xf32> to vector<2x1x256xf32>
    %47 = vector.shape_cast %46 : vector<2x1x256xf32> to vector<2x256xf32>
    %48 = vector.extract_strided_slice %39 {offsets = [0, 4, 0], sizes = [2, 1, 256], strides = [1, 1, 1]} : vector<2x8x256xf32> to vector<2x1x256xf32>
    %49 = vector.shape_cast %48 : vector<2x1x256xf32> to vector<2x256xf32>
    %50 = vector.extract_strided_slice %39 {offsets = [0, 5, 0], sizes = [2, 1, 256], strides = [1, 1, 1]} : vector<2x8x256xf32> to vector<2x1x256xf32>
    %51 = vector.shape_cast %50 : vector<2x1x256xf32> to vector<2x256xf32>
    %52 = vector.extract_strided_slice %39 {offsets = [0, 6, 0], sizes = [2, 1, 256], strides = [1, 1, 1]} : vector<2x8x256xf32> to vector<2x1x256xf32>
    %53 = vector.shape_cast %52 : vector<2x1x256xf32> to vector<2x256xf32>
    %54 = vector.extract_strided_slice %39 {offsets = [0, 7, 0], sizes = [2, 1, 256], strides = [1, 1, 1]} : vector<2x8x256xf32> to vector<2x1x256xf32>
    %55 = vector.shape_cast %54 : vector<2x1x256xf32> to vector<2x256xf32>
    %56 = tpu.concatenate %41, %43, %45, %47, %49, %51, %53, %55 in 1 : vector<2x256xf32>, vector<2x256xf32>, vector<2x256xf32>, vector<2x256xf32>, vector<2x256xf32>, vector<2x256xf32>, vector<2x256xf32>, vector<2x256xf32> -> vector<2x2048xf32>
    %c129 = arith.constant 129 : index
    %c0_10 = arith.constant 0 : index
    %57 = vector.load %arg5[%c129, %c0_10] : memref<168x128xf32, #tpu.memory_space<vmem>>, vector<1x128xf32>
    %58 = vector.extract_strided_slice %57 {offsets = [0, 0], sizes = [1, 32], strides = [1, 1]} : vector<1x128xf32> to vector<1x32xf32>
    %59 = vector.extract_strided_slice %57 {offsets = [0, 32], sizes = [1, 32], strides = [1, 1]} : vector<1x128xf32> to vector<1x32xf32>
    %60 = vector.extract_strided_slice %57 {offsets = [0, 64], sizes = [1, 32], strides = [1, 1]} : vector<1x128xf32> to vector<1x32xf32>
    %61 = vector.extract_strided_slice %57 {offsets = [0, 96], sizes = [1, 32], strides = [1, 1]} : vector<1x128xf32> to vector<1x32xf32>
    %c0_11 = arith.constant 0 : index
    %c0_12 = arith.constant 0 : index
    %62 = vector.load %arg4[%c0_11, %c0_12] : memref<2048x32xf32, #tpu.memory_space<vmem>>, vector<2048x32xf32>
    %cst_13 = arith.constant dense<0.000000e+00> : vector<2x32xf32>
    %63 = tpu.matmul %56, %62, %cst_13 {dimension_numbers = #tpu.dot_dimension_numbers<[1], [0], [0], [1], [0, 0, 1, 1], [], []>} : vector<2x2048xf32>, vector<2048x32xf32>, vector<2x32xf32> -> vector<2x32xf32>
    %64 = vector.broadcast %58 : vector<1x32xf32> to vector<2x32xf32>
    %65 = arith.addf %63, %64 : vector<2x32xf32>
    %cst_14 = arith.constant 0.000000e+00 : f32
    %66 = vector.broadcast %cst_14 : f32 to vector<2x32xf32>
    %67 = arith.cmpf ogt, %65, %66 : vector<2x32xf32>
    %cst_15 = arith.constant 0.00999999977 : f32
    %68 = vector.broadcast %cst_15 : f32 to vector<2x32xf32>
    %69 = arith.mulf %68, %65 : vector<2x32xf32>
    %70 = arith.select %67, %65, %69 : vector<2x32xi1>, vector<2x32xf32>
    %c0_16 = arith.constant 0 : index
    %c0_17 = arith.constant 0 : index
    %71 = vector.load %arg1[%c0_16, %c0_17] : memref<2x1xf32, #tpu.memory_space<vmem>>, vector<2x1xf32>
    %cst_18 = arith.constant 0.000000e+00 : f32
    %72 = vector.broadcast %cst_18 : f32 to vector<2x1xf32>
    %73 = arith.subf %71, %72 : vector<2x1xf32>
    %cst_19 = arith.constant 1.000000e+01 : f32
    %74 = vector.broadcast %cst_19 : f32 to vector<2x1xf32>
    %75 = arith.divf %73, %74 : vector<2x1xf32>
    %cst_20 = arith.constant 2.000000e+00 : f32
    %76 = vector.broadcast %cst_20 : f32 to vector<2x1xf32>
    %77 = arith.mulf %75, %76 : vector<2x1xf32>
    %cst_21 = arith.constant 1.000000e+00 : f32
    %78 = vector.broadcast %cst_21 : f32 to vector<2x1xf32>
    %79 = arith.subf %77, %78 : vector<2x1xf32>
    %80 = vector.broadcast %79 : vector<2x1xf32> to vector<2x32xf32>
    %81 = vector.broadcast %61 : vector<1x32xf32> to vector<2x32xf32>
    %82 = arith.mulf %80, %81 : vector<2x32xf32>
    %83 = vector.broadcast %59 : vector<1x32xf32> to vector<2x32xf32>
    %84 = arith.addf %82, %83 : vector<2x32xf32>
    %cst_22 = arith.constant 0.000000e+00 : f32
    %85 = vector.broadcast %cst_22 : f32 to vector<2x32xf32>
    %86 = arith.cmpf ogt, %84, %85 : vector<2x32xf32>
    %cst_23 = arith.constant 0.00999999977 : f32
    %87 = vector.broadcast %cst_23 : f32 to vector<2x32xf32>
    %88 = arith.mulf %87, %84 : vector<2x32xf32>
    %89 = arith.select %86, %84, %88 : vector<2x32xi1>, vector<2x32xf32>
    %c0_24 = arith.constant 0 : index
    %c0_25 = arith.constant 0 : index
    %90 = vector.load %arg2[%c0_24, %c0_25] : memref<2x2xf32, #tpu.memory_space<vmem>>, vector<2x2xf32>
    %c130 = arith.constant 130 : index
    %c0_26 = arith.constant 0 : index
    %91 = vector.load %arg5[%c130, %c0_26] : memref<168x128xf32, #tpu.memory_space<vmem>>, vector<2x128xf32>
    %92 = vector.extract_strided_slice %91 {offsets = [0, 0], sizes = [2, 32], strides = [1, 1]} : vector<2x128xf32> to vector<2x32xf32>
    %93 = vector.extract_strided_slice %91 {offsets = [0, 32], sizes = [1, 32], strides = [1, 1]} : vector<2x128xf32> to vector<1x32xf32>
    %94 = vector.extract_strided_slice %91 {offsets = [1, 32], sizes = [1, 16], strides = [1, 1]} : vector<2x128xf32> to vector<1x16xf32>
    %95 = vector.extract_strided_slice %90 {offsets = [0, 0], sizes = [2, 1], strides = [1, 1]} : vector<2x2xf32> to vector<2x1xf32>
    %96 = vector.extract_strided_slice %92 {offsets = [0, 0], sizes = [1, 32], strides = [1, 1]} : vector<2x32xf32> to vector<1x32xf32>
    %97 = vector.broadcast %95 : vector<2x1xf32> to vector<2x32xf32>
    %98 = vector.broadcast %96 : vector<1x32xf32> to vector<2x32xf32>
    %99 = arith.mulf %97, %98 : vector<2x32xf32>
    %100 = vector.extract_strided_slice %90 {offsets = [0, 1], sizes = [2, 1], strides = [1, 1]} : vector<2x2xf32> to vector<2x1xf32>
    %101 = vector.extract_strided_slice %92 {offsets = [1, 0], sizes = [1, 32], strides = [1, 1]} : vector<2x32xf32> to vector<1x32xf32>
    %102 = vector.broadcast %100 : vector<2x1xf32> to vector<2x32xf32>
    %103 = vector.broadcast %101 : vector<1x32xf32> to vector<2x32xf32>
    %104 = arith.mulf %102, %103 : vector<2x32xf32>
    %105 = arith.addf %99, %104 : vector<2x32xf32>
    %106 = vector.broadcast %60 : vector<1x32xf32> to vector<2x32xf32>
    %107 = arith.addf %105, %106 : vector<2x32xf32>
    %cst_27 = arith.constant 0.000000e+00 : f32
    %108 = vector.broadcast %cst_27 : f32 to vector<2x32xf32>
    %109 = arith.cmpf ogt, %107, %108 : vector<2x32xf32>
    %cst_28 = arith.constant 0.00999999977 : f32
    %110 = vector.broadcast %cst_28 : f32 to vector<2x32xf32>
    %111 = arith.mulf %110, %107 : vector<2x32xf32>
    %112 = arith.select %109, %107, %111 : vector<2x32xi1>, vector<2x32xf32>
    %cst_29 = arith.constant 0.000000e+00 : f32
    %113 = vector.broadcast %cst_29 : f32 to vector<2x32xf32>
    %114 = tpu.concatenate %70, %89, %112, %113 in 1 : vector<2x32xf32>, vector<2x32xf32>, vector<2x32xf32>, vector<2x32xf32> -> vector<2x128xf32>
    %c0_30 = arith.constant 0 : index
    %c0_31 = arith.constant 0 : index
    %115 = vector.load %arg5[%c0_30, %c0_31] : memref<168x128xf32, #tpu.memory_space<vmem>>, vector<128x128xf32>
    %cst_32 = arith.constant dense<0.000000e+00> : vector<2x128xf32>
    %116 = tpu.matmul %114, %115, %cst_32 {dimension_numbers = #tpu.dot_dimension_numbers<[1], [0], [0], [1], [0, 0, 1, 1], [], []>} : vector<2x128xf32>, vector<128x128xf32>, vector<2x128xf32> -> vector<2x128xf32>
    %c128 = arith.constant 128 : index
    %c0_33 = arith.constant 0 : index
    %117 = vector.load %arg5[%c128, %c0_33] : memref<168x128xf32, #tpu.memory_space<vmem>>, vector<1x128xf32>
    %118 = vector.broadcast %117 : vector<1x128xf32> to vector<2x128xf32>
    %119 = arith.addf %116, %118 : vector<2x128xf32>
    %120 = vector.extract_strided_slice %119 {offsets = [0, 0], sizes = [2, 32], strides = [1, 1]} : vector<2x128xf32> to vector<2x32xf32>
    %121 = arith.negf %120 : vector<2x32xf32>
    %122 = math.exp %121 : vector<2x32xf32>
    %cst_34 = arith.constant 1.000000e+00 : f32
    %123 = vector.broadcast %cst_34 : f32 to vector<2x32xf32>
    %124 = arith.addf %123, %122 : vector<2x32xf32>
    %125 = arith.divf %123, %124 : vector<2x32xf32>
    %126 = vector.extract_strided_slice %119 {offsets = [0, 64], sizes = [2, 32], strides = [1, 1]} : vector<2x128xf32> to vector<2x32xf32>
    %127 = math.tanh %126 : vector<2x32xf32>
    %128 = vector.extract_strided_slice %119 {offsets = [0, 96], sizes = [2, 32], strides = [1, 1]} : vector<2x128xf32> to vector<2x32xf32>
    %129 = arith.negf %128 : vector<2x32xf32>
    %130 = math.exp %129 : vector<2x32xf32>
    %cst_35 = arith.constant 1.000000e+00 : f32
    %131 = vector.broadcast %cst_35 : f32 to vector<2x32xf32>
    %132 = arith.addf %131, %130 : vector<2x32xf32>
    %133 = arith.divf %131, %132 : vector<2x32xf32>
    %134 = arith.mulf %125, %127 : vector<2x32xf32>
    %135 = math.tanh %134 : vector<2x32xf32>
    %136 = arith.mulf %133, %135 : vector<2x32xf32>
    %c136 = arith.constant 136 : index
    %c0_36 = arith.constant 0 : index
    %137 = vector.load %arg5[%c136, %c0_36] : memref<168x128xf32, #tpu.memory_space<vmem>>, vector<32x128xf32>
    %cst_37 = arith.constant 0.000000e+00 : f32
    %138 = vector.broadcast %cst_37 : f32 to vector<2x32xf32>
    %139 = arith.cmpf ogt, %136, %138 : vector<2x32xf32>
    %cst_38 = arith.constant 0.00999999977 : f32
    %140 = vector.broadcast %cst_38 : f32 to vector<2x32xf32>
    %141 = arith.mulf %140, %136 : vector<2x32xf32>
    %142 = arith.select %139, %136, %141 : vector<2x32xi1>, vector<2x32xf32>
    %143 = vector.extract_strided_slice %137 {offsets = [0, 0], sizes = [32, 32], strides = [1, 1]} : vector<32x128xf32> to vector<32x32xf32>
    %cst_39 = arith.constant dense<0.000000e+00> : vector<2x32xf32>
    %144 = tpu.matmul %142, %143, %cst_39 {dimension_numbers = #tpu.dot_dimension_numbers<[1], [0], [0], [1], [0, 0, 1, 1], [], []>} : vector<2x32xf32>, vector<32x32xf32>, vector<2x32xf32> -> vector<2x32xf32>
    %145 = vector.broadcast %93 : vector<1x32xf32> to vector<2x32xf32>
    %146 = arith.addf %144, %145 : vector<2x32xf32>
    %cst_40 = arith.constant 0.000000e+00 : f32
    %147 = vector.broadcast %cst_40 : f32 to vector<2x32xf32>
    %148 = arith.cmpf ogt, %146, %147 : vector<2x32xf32>
    %cst_41 = arith.constant 0.00999999977 : f32
    %149 = vector.broadcast %cst_41 : f32 to vector<2x32xf32>
    %150 = arith.mulf %149, %146 : vector<2x32xf32>
    %151 = arith.select %148, %146, %150 : vector<2x32xi1>, vector<2x32xf32>
    %152 = vector.extract_strided_slice %137 {offsets = [0, 32], sizes = [32, 16], strides = [1, 1]} : vector<32x128xf32> to vector<32x16xf32>
    %cst_42 = arith.constant dense<0.000000e+00> : vector<2x16xf32>
    %153 = tpu.matmul %151, %152, %cst_42 {dimension_numbers = #tpu.dot_dimension_numbers<[1], [0], [0], [1], [0, 0, 1, 1], [], []>} : vector<2x32xf32>, vector<32x16xf32>, vector<2x16xf32> -> vector<2x16xf32>
    %154 = vector.broadcast %94 : vector<1x16xf32> to vector<2x16xf32>
    %155 = arith.addf %153, %154 : vector<2x16xf32>
    %cst_43 = arith.constant 0.000000e+00 : f32
    %156 = vector.broadcast %cst_43 : f32 to vector<2x16xf32>
    %157 = arith.cmpf ogt, %155, %156 : vector<2x16xf32>
    %cst_44 = arith.constant 0.00999999977 : f32
    %158 = vector.broadcast %cst_44 : f32 to vector<2x16xf32>
    %159 = arith.mulf %158, %155 : vector<2x16xf32>
    %160 = arith.select %157, %155, %159 : vector<2x16xi1>, vector<2x16xf32>
    %cst_45 = arith.constant 0.000000e+00 : f32
    %161 = vector.broadcast %cst_45 : f32 to vector<2x48xf32>
    %162 = tpu.concatenate %160, %136, %134, %161 in 1 : vector<2x16xf32>, vector<2x32xf32>, vector<2x32xf32>, vector<2x48xf32> -> vector<2x128xf32>
    %c0_46 = arith.constant 0 : index
    %c0_47 = arith.constant 0 : index
    %163 = vector.load %arg6[%c0_46, %c0_47] : memref<2x128xf32, #tpu.memory_space<vmem>>, vector<2x128xf32>
    tpu.vector_store %arg6[%c0_46, %c0_47], %162 {strides = array<i32>} : memref<2x128xf32, #tpu.memory_space<vmem>>, vector<2x128xf32>,
    return
  }
}

</mosaic_0001>

<bundles_post_ra>
// kernel: summarizer_forward.1
= control target key start
LH: loop header
LB: loop body
LE: loop exit
PB: predicated region body
PF: predicated region fallthrough
CT: control target
= control target key end

     0   :  { %s2900_s23 = smov 4   ;;  %s2901_s24 = smov 124   ;;  %vm67_vm0 = vcmask 31744   ;;  %vm72_vm1 = vcmask 556032   ;;  %vm85_vm2 = vcmask 1040384   ;;  %vm133_vm3 = vcmask 1045504   ;;  %s4611_s0 = inlined_call_operand.vmem [shape: f32[2,16,64], index: 0, kind: input, shape index: {}]   ;;  %s4612_s3 = inlined_call_operand.vmem [shape: f32[257,256], index: 3, kind: input, shape index: {}]   ;;  %s4613_s4 = inlined_call_operand.vmem [shape: f32[2048,32], index: 4, kind: input, shape index: {}]   ;;  %s4614_s1 = inlined_call_operand.vmem [shape: f32[2,1], index: 1, kind: input, shape index: {}]   ;;  %s4615_s2 = inlined_call_operand.vmem [shape: f32[2,2], index: 2, kind: input, shape index: {}]   ;;  %s4616_s5 = inlined_call_operand.vmem [shape: f32[168,128], index: 5, kind: input, shape index: {}]   ;;  %s4617_s6 = inlined_call_operand.vmem [shape: f32[2,128], index: 6, kind: output, shape index: {}]  }
   0x1   :  { %v23_v0 = vld [vmem:[%s4611_s0] sm:$0xff]  ;;  %v24_v1 = vld [vmem:[%s4611_s0 + $0x8] sm:$0xff]  ;;  %s2902_s27 = smov 12   ;;  %v26_v2 = vld [vmem:[%s4611_s0 + $0x18] sm:$0xff]  ;;  %vm110_vm4 = vcmask 1046528   ;;  %s2903_s11 = smov 16  }
   0x2   :  { %43 = vrot.lane.b32.xlu1 %v23_v0, %s2900_s23  ;;  %31 = vrot.lane.b32.xlu0 %v23_v0, %s2901_s24  ;;  %v25_v3 = vld [vmem:[%s4611_s0 + $0x10] sm:$0xff]  ;;  %v202_v4 = vld [vmem:[%s4612_s3 + $0xf8] sm:$0xff]  ;;  %s2904_s12 = smov 72   ;;  %vm161_vm5 = vcmask 130048   ;;  %vm156_vm6 = vcmask 588800   ;;  %vm166_vm7 = vcmask 719872  }
   0x3   :  { %v201_v5 = vld [vmem:[%s4612_s3 + $0xf0] sm:$0xff]  ;;  %v200_v6 = vld [vmem:[%s4612_s3 + $0xe8] sm:$0xff]  ;;  %248 = vmatprep.subr.mxu0 %v202_v4  ;;  %v199_v7 = vld [vmem:[%s4612_s3 + $0xe0] sm:$0xff]  ;;  %vm569_vm12 = vcmask 1042434   ;;  %vm571_vm13 = vcmask 1043459   ;;  %vm573_vm14 = vcmask 1044484  }
   0x4   :  { %249 = vmatpush1.msra.mxu0 %v201_v5  ;;  %v198_v8 = vld [vmem:[%s4612_s3 + $0xd8] sm:$0xff]  ;;  %v197_v9 = vld [vmem:[%s4612_s3 + $0xd0] sm:$0xff]  ;;  %v196_v10 = vld [vmem:[%s4612_s3 + $0xc8] sm:$0xff]  ;;  %vm575_vm15 = vcmask 1045509   ;;  %s2906_s10 = smov 112   ;;  %s2912_s19 = smov 96  }
   0x5   :  { %250 = vmatprep.subr.mxu0 %v200_v6  ;;  %v195_v11 = vld [vmem:[%s4612_s3 + $0xc0] sm:$0xff]  ;;  %v194_v12 = vld [vmem:[%s4612_s3 + $0xb8] sm:$0xff]  ;;  %v193_v13 = vld [vmem:[%s4612_s3 + $0xb0] sm:$0xff]  ;;  %s2913_s20 = smov 48   ;;  %s2914_s21 = smov 32  }
   0x6   :  { %45 = vrot.lane.b32.xlu1 %v24_v1, %s2900_s23  ;;  %33 = vrot.lane.b32.xlu0 %v24_v1, %s2901_s24  ;;  %v192_v14 = vld [vmem:[%s4612_s3 + $0xa8] sm:$0xff]  ;;  %v191_v15 = vld [vmem:[%s4612_s3 + $0xa0] sm:$0xff] }
   0x7   :  { %251 = vmatpush1.msra.mxu0 %v199_v7  ;;  %v190_v16 = vld [vmem:[%s4612_s3 + $0x98] sm:$0xff]  ;;  %v189_v17 = vld [vmem:[%s4612_s3 + $0x90] sm:$0xff]  ;;  %v188_v18 = vld [vmem:[%s4612_s3 + $0x88] sm:$0xff] }
   0x8   :  { %252 = vmatprep.subr.mxu0 %v198_v8  ;;  %v187_v19 = vld [vmem:[%s4612_s3 + $0x80] sm:$0xff]  ;;  %v186_v20 = vld [vmem:[%s4612_s3 + $0x78] sm:$0xff]  ;;  %v185_v21 = vld [vmem:[%s4612_s3 + $0x70] sm:$0xff] }
   0x9   :  { %253 = vmatpush1.msra.mxu0 %v197_v9  ;;  %v184_v22 = vld [vmem:[%s4612_s3 + $0x68] sm:$0xff]  ;;  %v183_v23 = vld [vmem:[%s4612_s3 + $0x60] sm:$0xff]  ;;  %v182_v24 = vld [vmem:[%s4612_s3 + $0x58] sm:$0xff] }
   0xa   :  { %57 = vrot.lane.b32.xlu1 %v24_v1, %s2902_s27  ;;  %55 = vrot.lane.b32.xlu0 %v23_v0, %s2902_s27  ;;  %v181_v25 = vld [vmem:[%s4612_s3 + $0x50] sm:$0xff]  ;;  %v180_v26 = vld [vmem:[%s4612_s3 + $0x48] sm:$0xff] }
   0xb   :  { %254 = vmatprep.subr.mxu0 %v196_v10  ;;  %v179_v27 = vld [vmem:[%s4612_s3 + $0x40] sm:$0xff]  ;;  %v178_v28 = vld [vmem:[%s4612_s3 + $0x38] sm:$0xff]  ;;  %v177_v29 = vld [vmem:[%s4612_s3 + $0x30] sm:$0xff] }
   0xc   :  { %255 = vmatpush1.msra.mxu0 %v195_v11  ;;  %v176_v30 = vld [vmem:[%s4612_s3 + $0x28] sm:$0xff]  ;;  %v175_v31 = vld [vmem:[%s4612_s3 + $0x20] sm:$0xff]  ;;  %v174_v32 = vld [vmem:[%s4612_s3 + $0x18] sm:$0xff] }
   0xd   :  { %256 = vmatprep.subr.mxu0 %v194_v12  ;;  %v173_v33 = vld [vmem:[%s4612_s3 + $0x10] sm:$0xff]  ;;  %v172_v34 = vld [vmem:[%s4612_s3 + $0x8] sm:$0xff]  ;;  %v171_v35 = vld [vmem:[%s4612_s3] sm:$0xff] }
   0xe   :  { %37 = vrot.lane.b32.xlu1 %v26_v2, %s2901_s24  ;;  %35 = vrot.lane.b32.xlu0 %v25_v3, %s2901_s24  ;;  %v234_v36 = vld [vmem:[%s4612_s3 + $0x1f8] sm:$0xff]  ;;  %v233_v37 = vld [vmem:[%s4612_s3 + $0x1f0] sm:$0xff] }
   0xf   :  { %257 = vmatpush1.msra.mxu0 %v193_v13  ;;  %v232_v38 = vld [vmem:[%s4612_s3 + $0x1e8] sm:$0xff]  ;;  %v231_v39 = vld [vmem:[%s4612_s3 + $0x1e0] sm:$0xff]  ;;  %v230_v40 = vld [vmem:[%s4612_s3 + $0x1d8] sm:$0xff] }
  0x10   :  { %258 = vmatprep.subr.mxu0 %v192_v14  ;;  %v229_v41 = vld [vmem:[%s4612_s3 + $0x1d0] sm:$0xff]  ;;  %v228_v42 = vld [vmem:[%s4612_s3 + $0x1c8] sm:$0xff]  ;;  %v227_v43 = vld [vmem:[%s4612_s3 + $0x1c0] sm:$0xff] }
  0x11   :  { %259 = vmatpush1.msra.mxu0 %v191_v15  ;;  %v226_v44 = vld [vmem:[%s4612_s3 + $0x1b8] sm:$0xff]  ;;  %v225_v45 = vld [vmem:[%s4612_s3 + $0x1b0] sm:$0xff]  ;;  %v224_v46 = vld [vmem:[%s4612_s3 + $0x1a8] sm:$0xff] }
  0x12   :  { %49 = vrot.lane.b32.xlu1 %v26_v2, %s2900_s23  ;;  %47 = vrot.lane.b32.xlu0 %v25_v3, %s2900_s23  ;;  %v223_v47 = vld [vmem:[%s4612_s3 + $0x1a0] sm:$0xff]  ;;  %v222_v48 = vld [vmem:[%s4612_s3 + $0x198] sm:$0xff] }
  0x13   :  { %260 = vmatprep.subr.mxu0 %v190_v16  ;;  %v221_v49 = vld [vmem:[%s4612_s3 + $0x190] sm:$0xff]  ;;  %v220_v50 = vld [vmem:[%s4612_s3 + $0x188] sm:$0xff]  ;;  %v219_v51 = vld [vmem:[%s4612_s3 + $0x180] sm:$0xff] }
  0x14   :  { %261 = vmatpush1.msra.mxu0 %v189_v17  ;;  %v218_v52 = vld [vmem:[%s4612_s3 + $0x178] sm:$0xff]  ;;  %v217_v53 = vld [vmem:[%s4612_s3 + $0x170] sm:$0xff]  ;;  %v216_v54 = vld [vmem:[%s4612_s3 + $0x168] sm:$0xff] }
  0x15   :  { %262 = vmatprep.subr.mxu0 %v188_v18  ;;  %v215_v55 = vld [vmem:[%s4612_s3 + $0x160] sm:$0xff]  ;;  %v214_v56 = vld [vmem:[%s4612_s3 + $0x158] sm:$0xff]  ;;  %v213_v57 = vld [vmem:[%s4612_s3 + $0x150] sm:$0xff] }
  0x16   :  { %61 = vrot.lane.b32.xlu1 %v26_v2, %s2902_s27  ;;  %59 = vrot.lane.b32.xlu0 %v25_v3, %s2902_s27  ;;  %v212_v58 = vld [vmem:[%s4612_s3 + $0x148] sm:$0xff]  ;;  %v211_v59 = vld [vmem:[%s4612_s3 + $0x140] sm:$0xff] }
  0x17   :  { %263 = vmatpush1.msra.mxu0 %v187_v19  ;;  %v210_v60 = vld [vmem:[%s4612_s3 + $0x138] sm:$0xff]  ;;  %v209_v61 = vld [vmem:[%s4612_s3 + $0x130] sm:$0xff]  ;;  %v208_v62 = vld [vmem:[%s4612_s3 + $0x128] sm:$0xff] }
  0x18   :  { %264 = vmatprep.subr.mxu0 %v186_v20  ;;  %v207_v63 = vld [vmem:[%s4612_s3 + $0x120] sm:$0xff]  ;;  %v206_v0 = vld [vmem:[%s4612_s3 + $0x118] sm:$0xff]  ;;  %v205_v1 = vld [vmem:[%s4612_s3 + $0x110] sm:$0xff] }
  0x19   :  { %265 = vmatpush1.msra.mxu0 %v185_v21  ;;  %v204_v4 = vld [vmem:[%s4612_s3 + $0x108] sm:$0xff]  ;;  %v203_v5 = vld [vmem:[%s4612_s3 + $0x100] sm:$0xff] }
  0x1a   :  { %266 = vmatprep.subr.mxu0 %v184_v22 }
  0x1b   :  { %267 = vmatpush1.msra.mxu0 %v183_v23 }
  0x1c   :  { %268 = vmatprep.subr.mxu0 %v182_v24 }
  0x1d   :  { %269 = vmatpush1.msra.mxu0 %v181_v25 }
  0x1e   :  { %270 = vmatprep.subr.mxu0 %v180_v26 }
  0x1f   :  { %271 = vmatpush1.msra.mxu0 %v179_v27 }
  0x20   :  { %272 = vmatprep.subr.mxu0 %v178_v28 }
  0x21   :  { %273 = vmatpush1.msra.mxu0 %v177_v29 }
  0x22   :  { %274 = vmatprep.subr.mxu0 %v176_v30 }
  0x23   :  { %275 = vmatpush1.msra.mxu0 %v175_v31 }
  0x24   :  { %276 = vmatprep.subr.mxu0 %v174_v32 }
  0x25   :  { %277 = vmatpush1.msra.mxu0 %v173_v33 }
  0x26   :  { %278 = vmatprep.subr.mxu0 %v172_v34 }
  0x27   :  { %279 = vmatpush1.msra.mxu0 %v171_v35 }
  0x28   :  { %280 = vmatprep.subr.mxu0 %v234_v36 }
  0x29   :  { %281 = vmatpush2.msra.mxu0 %v233_v37 }
  0x2a   :  { %282 = vmatprep.subr.mxu0 %v232_v38 }
  0x2b   :  { %283 = vmatpush2.msra.mxu0 %v231_v39 }
  0x2c   :  { %284 = vmatprep.subr.mxu0 %v230_v40 }
  0x2d   :  { %285 = vmatpush2.msra.mxu0 %v229_v41 }
  0x2e   :  { %286 = vmatprep.subr.mxu0 %v228_v42 }
  0x2f   :  { %287 = vmatpush2.msra.mxu0 %v227_v43 }
  0x30   :  { %288 = vmatprep.subr.mxu0 %v226_v44 }
  0x31   :  { %289 = vmatpush2.msra.mxu0 %v225_v45 }
  0x32   :  { %290 = vmatprep.subr.mxu0 %v224_v46 }
  0x33   :  { %291 = vmatpush2.msra.mxu0 %v223_v47 }
  0x34   :  { %292 = vmatprep.subr.mxu0 %v222_v48 }
  0x35   :  { %293 = vmatpush2.msra.mxu0 %v221_v49 }
  0x36   :  { %294 = vmatprep.subr.mxu0 %v220_v50 }
  0x37   :  { %295 = vmatpush2.msra.mxu0 %v219_v51 }
  0x38   :  { %296 = vmatprep.subr.mxu0 %v218_v52 }
  0x39   :  { %297 = vmatpush2.msra.mxu0 %v217_v53 }
  0x3a   :  { %298 = vmatprep.subr.mxu0 %v216_v54 }
  0x3b   :  { %299 = vmatpush2.msra.mxu0 %v215_v55 }
  0x3c   :  { %300 = vmatprep.subr.mxu0 %v214_v56 }
  0x3d   :  { %301 = vmatpush2.msra.mxu0 %v213_v57 }
  0x3e   :  { %302 = vmatprep.subr.mxu0 %v212_v58 }
  0x3f   :  { %303 = vmatpush2.msra.mxu0 %v211_v59 }
  0x40   :  { %304 = vmatprep.subr.mxu0 %v210_v60 }
  0x41   :  { %305 = vmatpush2.msra.mxu0 %v209_v61 }
  0x42   :  { %306 = vmatprep.subr.mxu0 %v208_v62 }
  0x43   :  { %307 = vmatpush2.msra.mxu0 %v207_v63 }
  0x44   :  { %308 = vmatprep.subr.mxu0 %v206_v0 }
  0x45   :  { %309 = vmatpush2.msra.mxu0 %v205_v1 }
  0x46   :  { %310 = vmatprep.subr.mxu0 %v204_v4 }
  0x47   :  { %311 = vmatpush2.msra.mxu0 %v203_v5 }
  0x74   :  { %v44_v2 = vpop.permute.xlu1 %43  ;;  %v32_v3 = vpop.permute.xlu0 %31 }
  0x75   :  { %v68_v8 = vsel %vm67_vm0, %v32_v3, %v44_v2 }
  0x78   :  { %v46_v6 = vpop.permute.xlu1 %45  ;;  %v34_v7 = vpop.permute.xlu0 %33 }
  0x79   :  { %v69_v9 = vsel %vm67_vm0, %v34_v7, %v46_v6 }
  0x7c   :  { %v58_v10 = vpop.permute.xlu1 %57  ;;  %v56_v11 = vpop.permute.xlu0 %55 }
  0x7d   :  { %v74_v12 = vsel %vm72_vm1, %v69_v9, %v58_v10  ;;  %v73_v13 = vsel %vm72_vm1, %v68_v8, %v56_v11  ;;  %v1317_v10 = vld [vmem:[%s4613_s4 + $0xf8] sm:$0xff] }
  0x7e   :  { %v87_v14 = vrot.slane %v74_v12, 7  ;;  %v98_v15 = vrot.slane %v74_v12, 5  ;;  %v79_v16 = vrot.slane %v73_v13, 1  ;;  %v86_v17 = vrot.slane %v73_v13, 7  ;;  %v1301_v11 = vld [vmem:[%s4613_s4 + $0x78] sm:$0xff]  ;;  %v1316_v12 = vld [vmem:[%s4613_s4 + $0xf0] sm:$0xff]  ;;  %2508 = vmatprep.subr.mxu1 %v1317_v10 }
  0x7f   :  { %v1381_v13 = vld [vmem:[%s4613_s4 + $0x2f8] sm:$0xff]  ;;  %2509 = vmatpush3.msra.mxu1 %v1301_v11 }
  0x80   :  { %v3159_v18 = vsel %vm85_vm2, %v86_v17, %v87_v14  ;;  %v102_v19 = vsel %vm85_vm2, %v79_v16, %v86_v17  ;;  %v38_v20 = vpop.permute.xlu1 %37  ;;  %v36_v21 = vpop.permute.xlu0 %35  ;;  %v104_v22 = vsel %vm85_vm2, %v87_v14, %v98_v15  ;;  %v1300_v14 = vld [vmem:[%s4613_s4 + $0x70] sm:$0xff]  ;;  %v1365_v15 = vld [vmem:[%s4613_s4 + $0x278] sm:$0xff]  ;;  %2578 = vmatprep.subr.mxu0 %v1381_v13  ;;  %v1315_v16 = vld [vmem:[%s4613_s4 + $0xe8] sm:$0xff]  ;;  %2510 = vmatprep.subr.mxu1 %v1316_v12 }
  0x81   :  { %v134_v23 = vrot.slane %v102_v19, 2  ;;  %v135_v24 = vrot.slane %v3159_v18, 2  ;;  %v111_v25 = vrot.slane %v102_v19, 1  ;;  %v112_v26 = vrot.slane %v3159_v18, 1  ;;  %v1380_v17 = vld [vmem:[%s4613_s4 + $0x2f0] sm:$0xff]  ;;  %2511 = vmatpush3.msra.mxu1 %v1300_v14 }
  0x82   :  { %v137_v29 = vrot.slane %v104_v22, 2  ;;  %v114_v30 = vrot.slane %v104_v22, 1  ;;  %2512 = vmatprep.subr.mxu1 %v1315_v16 }
  0x83   :  { %v136_v27 = vsel %vm133_vm3, %v134_v23, %v135_v24  ;;  %v113_v28 = vsel %vm110_vm4, %v111_v25, %v112_v26  ;;  %v2480_v23 = vld [vmem:[%s4612_s3 + $0x200] ss:$8 sm:$0x3] }
  0x84   :  { %v50_v31 = vpop.permute.xlu1 %49  ;;  %144 = vrot.lane.b32.xlu1 %v136_v27, %s2903_s11  ;;  %121 = vrot.lane.b32.xlu0 %v113_v28, %s2904_s12  ;;  %v48_v32 = vpop.permute.xlu0 %47  ;;  %v138_v33 = vsel %vm133_vm3, %v135_v24, %v137_v29  ;;  %v115_v34 = vsel %vm110_vm4, %v112_v26, %v114_v30  ;;  %v2905_v26 = vmov 1983009808  }
  0x85   :  { %v71_v35 = vsel %vm67_vm0, %v38_v20, %v50_v31  ;;  %v70_v36 = vsel %vm67_vm0, %v36_v21, %v48_v32  ;;  %v238_v20 = vlaneseq  ;;  %v372_v27 = vunpack.c.l.s4 %v2905_v26 }
  0x87   :  { %v239_v21 = vshrl.u32 %v238_v20, 7  ;;  %v373_v32 = vunpack.c.0.s8 %v372_v27 }
  0x88   :  { %v62_v37 = vpop.permute.xlu1 %61  ;;  %146 = vrot.lane.b32.xlu1 %v138_v33, %s2903_s11  ;;  %123 = vrot.lane.b32.xlu0 %v115_v34, %s2904_s12  ;;  %v60_v38 = vpop.permute.xlu0 %59 }
  0x89   :  { %v76_v39 = vsel %vm72_vm1, %v71_v35, %v62_v37  ;;  %v75_v40 = vsel %vm72_vm1, %v70_v36, %v60_v38  ;;  %v3231_v22 = vsub.s32 0, %v239_v21  ;;  %v3236_v24 = vsub.s32 1, %v239_v21 }
  0x8a   :  { %v90_v41 = vrot.slane %v76_v39, 7  ;;  %v99_v42 = vrot.slane %v76_v39, 5  ;;  %v80_v43 = vrot.slane %v75_v40, 1  ;;  %v89_v44 = vrot.slane %v75_v40, 7 }
  0x8b   :  { %v3239_v25 = vrot.slane %v2480_v23, %v3231_v22  ;;  %v3242_v28 = vrot.slane %v2480_v23, %v3236_v24  ;;  %v3246_v37 = vsub.s32 %v373_v32, %v239_v21 }
  0x8c   :  { %v91_v45 = vsel %vm85_vm2, %v89_v44, %v90_v41  ;;  %v103_v46 = vsel %vm85_vm2, %v80_v43, %v89_v44  ;;  %v105_v47 = vsel %vm85_vm2, %v90_v41, %v99_v42 }
  0x8d   :  { %v139_v48 = vrot.slane %v103_v46, 2  ;;  %v140_v49 = vrot.slane %v91_v45, 2  ;;  %v116_v50 = vrot.slane %v103_v46, 1  ;;  %v117_v51 = vrot.slane %v91_v45, 1 }
  0x8e   :  { %v142_v54 = vrot.slane %v105_v47, 2  ;;  %v119_v55 = vrot.slane %v105_v47, 1 }
  0x8f   :  { %v141_v52 = vsel %vm133_vm3, %v139_v48, %v140_v49  ;;  %v118_v53 = vsel %vm110_vm4, %v116_v50, %v117_v51 }
  0x90   :  { %148 = vrot.lane.b32.xlu1 %v141_v52, %s2903_s11  ;;  %125 = vrot.lane.b32.xlu0 %v118_v53, %s2904_s12  ;;  %v143_v56 = vsel %vm133_vm3, %v140_v49, %v142_v54  ;;  %v120_v57 = vsel %vm110_vm4, %v117_v51, %v119_v55  ;;  %v3252_v49 = vsub.s32 3, %v239_v21  ;;  %v3258_v54 = vsub.s32 2, %v239_v21 }
  0x91   :  { %vm577_vm3 = vcmask 1046534   ;;  %vm579_vm4 = vcmask 1047559  }
  0x94   :  { %150 = vrot.lane.b32.xlu1 %v143_v56, %s2903_s11  ;;  %127 = vrot.lane.b32.xlu0 %v120_v57, %s2904_s12 }
  0xf6   :  { %v145_v58 = vpop.permute.xlu1 %144  ;;  %v122_v59 = vpop.permute.xlu0 %121 }
  0xf7   :  { %v162_v60 = vsel %vm161_vm5, %v122_v59, %v145_v58  ;;  %v157_v61 = vsel %vm156_vm6, %v102_v19, %v122_v59  ;;  %v1364_v19 = vld [vmem:[%s4613_s4 + $0x270] sm:$0xff] }
  0xf8   :  { %2481 = vmatprep.mubr.msk.f32.mxu0 %vm166_vm7, %v162_v60 }
  0xf9   :  { %313 = vmatmul.mubr.f32.vlgmr.msra.gmra.mxu0 %v157_v61 }
  0xfa   :  { %v147_v62 = vpop.permute.xlu1 %146  ;;  %v124_v63 = vpop.permute.xlu0 %123  ;;  %2579 = vmatpush3.msra.mxu0 %v1365_v15 }
  0xfb   :  { %v163_v0 = vsel %vm161_vm5, %v124_v63, %v147_v62  ;;  %v158_v1 = vsel %vm156_vm6, %v3159_v18, %v124_v63  ;;  %v1299_v18 = vld [vmem:[%s4613_s4 + $0x68] sm:$0xff]  ;;  %2580 = vmatprep.subr.mxu0 %v1380_v17 }
  0xfc   :  { %2482 = vmatprep.mubr.msk.f32.mxu0 %vm166_vm7, %v163_v0  ;;  %2581 = vmatpush3.msra.mxu0 %v1364_v19 }
  0xfd   :  { %319 = vmatmul.mubr.f32.gmra.mxu0 %v158_v1  ;;  %2513 = vmatpush3.msra.mxu1 %v1299_v18 }
 0x102   :  { %v149_v2 = vpop.permute.xlu1 %148  ;;  %v126_v3 = vpop.permute.xlu0 %125 }
 0x103   :  { %v164_v4 = vsel %vm161_vm5, %v126_v3, %v149_v2  ;;  %v159_v5 = vsel %vm156_vm6, %v103_v46, %v126_v3 }
 0x104   :  { %2483 = vmatprep.mubr.msk.f32.mxu0 %vm166_vm7, %v164_v4 }
 0x105   :  { %325 = vmatmul.mubr.f32.gmra.mxu0 %v159_v5 }
 0x106   :  { %v151_v6 = vpop.permute.xlu1 %150  ;;  %v128_v7 = vpop.permute.xlu0 %127 }
 0x107   :  { %v165_v8 = vsel %vm161_vm5, %v128_v7, %v151_v6  ;;  %v160_v9 = vsel %vm156_vm6, %v91_v45, %v128_v7 }
 0x108   :  { %2484 = vmatprep.mubr.msk.f32.mxu0 %vm166_vm7, %v165_v8 }
 0x109   :  { %331 = vmatmul.mubr.f32.gmra.mxu0 %v160_v9 }
 0x1b9   :  { %v314_v29 = vpop.f32.mrf.mxu0 }
 0x1ba   :  { %v315_v30 = vadd.f32 %v314_v29, %v3239_v25 }
 0x1bb   :  { %v316_v31 = vpop.f32.mrf.mxu0 }
 0x1bc   :  { %v345_v33 = vmul.f32 0.01, %v315_v30  ;;  %v317_v34 = vadd.f32 %v316_v31, %v3242_v28  ;;  %vm337_vm8 = vcmp.gt.f32.partialorder %v315_v30, 0.0 }
 0x1bd   :  { %v320_v35 = vpop.f32.mrf.mxu0 }
 0x1be   :  { %vm338_vm9 = vcmp.gt.f32.partialorder %v317_v34, 0.0  ;;  %v346_v36 = vmul.f32 0.01, %v317_v34  ;;  %v321_v38 = vadd.f32 %v320_v35, %v3239_v25  ;;  %v353_v40 = vsel %vm337_vm8, %v315_v30, %v345_v33 }
 0x1bf   :  { %v322_v39 = vpop.f32.mrf.mxu0  ;;  %vm895_vm8 = vcmask 1041409  }
 0x1c0   :  { %v354_v41 = vsel %vm338_vm9, %v317_v34, %v346_v36  ;;  %v323_v42 = vadd.f32 %v322_v39, %v3242_v28  ;;  %v347_v47 = vmul.f32 0.01, %v321_v38  ;;  %vm339_vm11 = vcmp.gt.f32.partialorder %v321_v38, 0.0 }
 0x1c1   :  { %v369_v43 = vcombine.low %v353_v40, %v354_v41  ;;  %v370_v44 = vcombine.high %v353_v40, %v354_v41 }
 0x1c2   :  { %vm340_vm10 = vcmp.gt.f32.partialorder %v323_v42, 0.0  ;;  %v348_v45 = vmul.f32 0.01, %v323_v42  ;;  %v355_v55 = vsel %vm339_vm11, %v321_v38, %v347_v47  ;;  %vm2911_vm11 = vmmov 0  }
 0x1c3   :  { %v377_v46 = vrot.slane %v369_v43, %v3246_v37  ;;  %v384_v48 = vrot.slane %v370_v44, %v3246_v37 }
 0x1c4   :  { %v356_v51 = vsel %vm340_vm10, %v323_v42, %v348_v45 }
 0x1c5   :  { %v3254_v50 = vcombine.high %v377_v46, %v377_v46  ;;  %v326_v52 = vpop.f32.mrf.mxu0  ;;  %v3260_v57 = vcombine.high %v384_v48, %v384_v48  ;;  %v460_v58 = vrot.slane %v377_v46, %v3236_v24  ;;  %v464_v59 = vrot.slane %v377_v46, %v3252_v49 }
 0x1c6   :  { %v387_v60 = vcombine.low %v355_v55, %v356_v51  ;;  %v2485_v62 = vrot.slane %v377_v46, 9  ;;  %v327_v63 = vadd.f32 %v326_v52, %v3239_v25  ;;  %v2487_v3 = vrot.slane %v384_v48, 9 }
 0x1c7   :  { %v468_v53 = vrot.slane %v3254_v50, %v3236_v24  ;;  %v328_v56 = vpop.f32.mrf.mxu0  ;;  %v472_v61 = vrot.slane %v3254_v50, %v3252_v49  ;;  %v388_v4 = vcombine.high %v355_v55, %v356_v51  ;;  %v476_v8 = vrot.slane %v384_v48, %v3236_v24 }
 0x1c8   :  { %v329_v0 = vadd.f32 %v328_v56, %v3242_v28  ;;  %v3270_v5 = vrot.slane %v387_v60, %v3246_v37  ;;  %vm341_vm0 = vcmp.gt.f32.partialorder %v327_v63, 0.0  ;;  %v349_v6 = vmul.f32 0.01, %v327_v63 }
 0x1c9   :  { %v332_v1 = vpop.f32.mrf.mxu0  ;;  %v570_v2 = vsel %vm569_vm12, %v468_v53, %v460_v58  ;;  %v480_v9 = vrot.slane %v384_v48, %v3252_v49  ;;  %v484_v10 = vrot.slane %v3260_v57, %v3236_v24  ;;  %v488_v11 = vrot.slane %v3260_v57, %v3252_v49 }
 0x1ca   :  { %vm342_vm1 = vcmp.gt.f32.partialorder %v329_v0, 0.0  ;;  %v350_v7 = vmul.f32 0.01, %v329_v0  ;;  %v581_v13 = vsel %vm569_vm12, %v472_v61, %v464_v59  ;;  %v3279_v14 = vmax.f32 %v377_v46, %v2485_v62 }
 0x1cb   :  { %v334_v12 = vpop.f32.mrf.mxu0  ;;  %v357_v15 = vsel %vm341_vm0, %v327_v63, %v349_v6  ;;  %v572_v17 = vsel %vm571_vm13, %v476_v8, %v570_v2  ;;  %v3283_v18 = vrot.slane %v388_v4, %v3246_v37  ;;  %v3285_v21 = vmax.f32 %v384_v48, %v2487_v3 }
 0x1cc   :  { %v358_v16 = vsel %vm342_vm1, %v329_v0, %v350_v7  ;;  %v3289_v23 = vcombine.high %v3270_v5, %v3270_v5  ;;  %v333_v26 = vadd.f32 %v332_v1, %v3239_v25  ;;  %v335_v27 = vadd.f32 %v334_v12, %v3242_v28 }
 0x1cd   :  { %v405_v19 = vcombine.low %v357_v15, %v358_v16  ;;  %v406_v20 = vcombine.high %v357_v15, %v358_v16  ;;  %v582_v29 = vsel %vm571_vm13, %v480_v9, %v581_v13  ;;  %v492_v30 = vrot.slane %v3270_v5, %v3236_v24 }
 0x1ce   :  { %v496_v31 = vrot.slane %v3270_v5, %v3252_v49  ;;  %v351_v34 = vmul.f32 0.01, %v333_v26  ;;  %v352_v35 = vmul.f32 0.01, %v335_v27  ;;  %v574_v25 = vsel %vm573_vm14, %v484_v10, %v572_v17 }
 0x1cf   :  { %v3299_v32 = vrot.slane %v405_v19, %v3246_v37  ;;  %v3302_v33 = vrot.slane %v406_v20, %v3246_v37  ;;  %v508_v28 = vrot.slane %v3283_v18, %v3236_v24  ;;  %vm343_vm6 = vcmp.gt.f32.partialorder %v333_v26, 0.0 }
 0x1d0   :  { %vm344_vm7 = vcmp.gt.f32.partialorder %v335_v27, 0.0  ;;  %v500_v38 = vrot.slane %v3289_v23, %v3236_v24  ;;  %v504_v39 = vrot.slane %v3289_v23, %v3252_v49  ;;  %v512_v40 = vrot.slane %v3283_v18, %v3252_v49 }
 0x1d1   :  { %v3309_v36 = vcombine.high %v3299_v32, %v3299_v32  ;;  %v2489_v41 = vrot.slane %v3270_v5, 9  ;;  %v404_v43 = vcombine.high %v3283_v18, %v3283_v18  ;;  %v576_v44 = vsel %vm575_vm15, %v492_v30, %v574_v25 }
 0x1d2   :  { %v583_v45 = vsel %vm573_vm14, %v488_v11, %v582_v29  ;;  %v3326_v46 = vcombine.high %v3302_v33, %v3302_v33  ;;  %v359_v48 = vsel %vm343_vm6, %v333_v26, %v351_v34  ;;  %v360_v51 = vsel %vm344_vm7, %v335_v27, %v352_v35 }
 0x1d3   :  { %v524_v42 = vrot.slane %v3309_v36, %v3236_v24  ;;  %v528_v47 = vrot.slane %v3309_v36, %v3252_v49  ;;  %v516_v52 = vrot.slane %v3299_v32, %v3236_v24  ;;  %v520_v53 = vrot.slane %v3299_v32, %v3252_v49 }
 0x1d4   :  { %v423_v55 = vcombine.low %v359_v48, %v360_v51  ;;  %v424_v56 = vcombine.high %v359_v48, %v360_v51  ;;  %v532_v58 = vrot.slane %v3302_v33, %v3236_v24  ;;  %v536_v59 = vrot.slane %v3302_v33, %v3252_v49 }
 0x1d5   :  { %v578_v60 = vsel %vm577_vm3, %v500_v38, %v576_v44  ;;  %v584_v61 = vsel %vm575_vm15, %v496_v31, %v583_v45  ;;  %v587_v62 = vsel %vm569_vm12, %v524_v42, %v516_v52  ;;  %v593_v2 = vsel %vm569_vm12, %v528_v47, %v520_v53 }
 0x1d6   :  { %v3342_v63 = vrot.slane %v423_v55, %v3246_v37  ;;  %v580_v0 = vsel %vm579_vm4, %v508_v28, %v578_v60  ;;  %v585_v1 = vsel %vm577_vm3, %v504_v39, %v584_v61  ;;  %v2493_v3 = vrot.slane %v3299_v32, 9 }
 0x1d7   :  { %v3349_v4 = vrot.slane %v424_v56, %v3246_v37  ;;  %v586_v6 = vsel %vm579_vm4, %v512_v40, %v585_v1  ;;  %v540_v7 = vrot.slane %v3326_v46, %v3236_v24  ;;  %v544_v8 = vrot.slane %v3326_v46, %v3252_v49 }
 0x1d8   :  { %v2495_v9 = vrot.slane %v3302_v33, 9  ;;  %v3359_v10 = vcombine.high %v3342_v63, %v3342_v63  ;;  %v588_v11 = vsel %vm571_vm13, %v532_v58, %v587_v62  ;;  %v603_v12 = vsel %vm85_vm2, -3e+38, %v580_v0 }
 0x1d9   :  { %v604_v13 = vsel %vm85_vm2, -3e+38, %v586_v6  ;;  %v2486_v15 = vrot.slane %v3254_v50, 9  ;;  %v594_v16 = vsel %vm571_vm13, %v536_v59, %v593_v2  ;;  %v548_v17 = vrot.slane %v3342_v63, %v3236_v24 }
 0x1da   :  { %v552_v19 = vrot.slane %v3342_v63, %v3252_v49  ;;  %v2488_v20 = vrot.slane %v3260_v57, 9  ;;  %v564_v26 = vrot.slane %v3349_v4, %v3236_v24  ;;  %v568_v27 = vrot.slane %v3349_v4, %v3252_v49 }
 0x1db   :  { %v2490_v29 = vrot.slane %v3289_v23, 9  ;;  %v2491_v30 = vrot.slane %v3283_v18, 9  ;;  %v556_v31 = vrot.slane %v3359_v10, %v3236_v24  ;;  %v560_v34 = vrot.slane %v3359_v10, %v3252_v49 }
 0x1dc   :  { %v675_v35 = vcombine.low %v603_v12, %v604_v13  ;;  %v676_v25 = vcombine.high %v603_v12, %v604_v13  ;;  %v2492_v28 = vrot.slane %v404_v43, 9  ;;  %v656_v38 = vmax.f32 %v3254_v50, %v2486_v15 }
 0x1dd   :  { %v589_v39 = vsel %vm573_vm14, %v540_v7, %v588_v11  ;;  %v595_v40 = vsel %vm573_vm14, %v544_v8, %v594_v16  ;;  %v658_v48 = vmax.f32 %v3260_v57, %v2488_v20  ;;  %v659_v49 = vmax.f32 %v3270_v5, %v2489_v41 }
 0x1de   :  { %v683_v42 = vrot.slane %v675_v35, %v3246_v37  ;;  %v690_v44 = vrot.slane %v676_v25, %v3246_v37  ;;  %v590_v45 = vsel %vm575_vm15, %v548_v17, %v589_v39  ;;  %v596_v47 = vsel %vm575_vm15, %v552_v19, %v595_v40  ;;  %v1379_v39 = vld [vmem:[%s4613_s4 + $0x2e8] sm:$0xff] }
 0x1df   :  { %v660_v51 = vmax.f32 %v3289_v23, %v2490_v29  ;;  %v661_v50 = vmax.f32 %v3283_v18, %v2491_v30  ;;  %v662_v58 = vmax.f32 %v404_v43, %v2492_v28  ;;  %v591_v60 = vsel %vm577_vm3, %v556_v31, %v590_v45  ;;  %2582 = vmatprep.subr.mxu0 %v1379_v39 }
 0x1e0   :  { %v691_v52 = vcombine.high %v683_v42, %v683_v42  ;;  %v692_v53 = vcombine.high %v690_v44, %v690_v44  ;;  %v711_v55 = vrot.slane %v683_v42, 1  ;;  %v713_v56 = vrot.slane %v690_v44, 1 }
 0x1e1   :  { %v3393_v59 = vmax.f32 %v3279_v14, %v683_v42  ;;  %v597_v61 = vsel %vm577_vm3, %v560_v34, %v596_v47  ;;  %v3402_v18 = vmax.f32 %v659_v49, %v690_v44  ;;  %v3422_v7 = vcombine.high %v3349_v4, %v3349_v4  ;;  %v1298_v47 = vld [vmem:[%s4613_s4 + $0x60] sm:$0xff] }
 0x1e2   :  { %v712_v62 = vrot.slane %v691_v52, 1  ;;  %v714_v57 = vrot.slane %v692_v53, 1  ;;  %v3397_v0 = vmax.f32 %v656_v38, %v711_v55  ;;  %v3400_v5 = vmax.f32 %v3285_v21, %v691_v52  ;;  %v1314_v38 = vld [vmem:[%s4613_s4 + $0xe0] sm:$0xff] }
 0x1e3   :  { %v3404_v23 = vmax.f32 %v660_v51, %v713_v56  ;;  %v3406_v41 = vmax.f32 %v661_v50, %v692_v53  ;;  %v774_v14 = vrot.slane %v3393_v59, %v3258_v54  ;;  %v592_v8 = vsel %vm579_vm4, %v564_v26, %v591_v60  ;;  %2514 = vmatprep.subr.mxu1 %v1314_v38  ;;  %v1313_v53 = vld [vmem:[%s4613_s4 + $0xd8] sm:$0xff]  ;;  %v1378_v55 = vld [vmem:[%s4613_s4 + $0x2e0] sm:$0xff] }
 0x1e4   :  { %v3410_v43 = vmax.f32 %v658_v48, %v712_v62  ;;  %v3412_v1 = vmax.f32 %v662_v58, %v714_v57  ;;  %v782_v2 = vrot.slane %v3397_v0, %v3258_v54  ;;  %v790_v21 = vrot.slane %v3400_v5, %v3258_v54  ;;  %v1363_v48 = vld [vmem:[%s4613_s4 + $0x268] sm:$0xff]  ;;  %2515 = vmatpush3.msra.mxu1 %v1298_v47  ;;  %v1297_v62 = vld [vmem:[%s4613_s4 + $0x58] sm:$0xff] }
 0x1e5   :  { %v778_v6 = vrot.slane %v3397_v0, %v3231_v22  ;;  %v598_v11 = vsel %vm579_vm4, %v568_v27, %v597_v61  ;;  %v770_v15 = vrot.slane %v3393_v59, %v3231_v22  ;;  %v786_v16 = vrot.slane %v3400_v5, %v3231_v22  ;;  %2583 = vmatpush3.msra.mxu0 %v1363_v48 }
 0x1e6   :  { %v798_v12 = vrot.slane %v3410_v43, %v3258_v54  ;;  %v903_v13 = vsel %vm895_vm8, %v782_v2, %v774_v14  ;;  %v806_v17 = vrot.slane %v3402_v18, %v3258_v54  ;;  %v814_v19 = vrot.slane %v3404_v23, %v3258_v54  ;;  %2516 = vmatprep.subr.mxu1 %v1313_v53  ;;  %v1294_v53 = vld [vmem:[%s4613_s4 + $0x40] sm:$0xff] }
 0x1e7   :  { %v904_v20 = vsel %vm569_vm12, %v790_v21, %v903_v13  ;;  %v794_v26 = vrot.slane %v3410_v43, %v3231_v22  ;;  %v822_v27 = vrot.slane %v3406_v41, %v3258_v54  ;;  %v830_v29 = vrot.slane %v3412_v1, %v3258_v54  ;;  %v1362_v21 = vld [vmem:[%s4613_s4 + $0x260] sm:$0xff]  ;;  %2584 = vmatprep.subr.mxu0 %v1378_v55 }
 0x1e8   :  { %v905_v30 = vsel %vm571_vm13, %v798_v12, %v904_v20  ;;  %v896_v31 = vsel %vm895_vm8, %v778_v6, %v770_v15  ;;  %v802_v35 = vrot.slane %v3402_v18, %v3231_v22  ;;  %v810_v25 = vrot.slane %v3404_v23, %v3231_v22  ;;  %v1312_v6 = vld [vmem:[%s4613_s4 + $0xd0] sm:$0xff]  ;;  %v1377_v15 = vld [vmem:[%s4613_s4 + $0x2d8] sm:$0xff]  ;;  %2517 = vmatpush3.msra.mxu1 %v1297_v62 }
 0x1e9   :  { %v906_v34 = vsel %vm573_vm14, %v806_v17, %v905_v30  ;;  %v897_v28 = vsel %vm569_vm12, %v786_v16, %v896_v31  ;;  %v605_v44 = vsel %vm85_vm2, -3e+38, %v592_v8  ;;  %v606_v45 = vsel %vm85_vm2, -3e+38, %v598_v11  ;;  %2585 = vmatpush3.msra.mxu0 %v1362_v21  ;;  %2518 = vmatprep.subr.mxu1 %v1312_v6  ;;  %v1374_v21 = vld [vmem:[%s4613_s4 + $0x2c0] sm:$0xff] }
 0x1ea   :  { %v907_v40 = vsel %vm575_vm15, %v814_v19, %v906_v34  ;;  %v898_v42 = vsel %vm571_vm13, %v794_v26, %v897_v28  ;;  %v818_v51 = vrot.slane %v3406_v41, %v3231_v22  ;;  %v2494_v52 = vrot.slane %v3309_v36, 9  ;;  %v1296_v26 = vld [vmem:[%s4613_s4 + $0x50] sm:$0xff]  ;;  %2586 = vmatprep.subr.mxu0 %v1377_v15 }
 0x1eb   :  { %v908_v49 = vsel %vm577_vm3, %v822_v27, %v907_v40  ;;  %v899_v50 = vsel %vm573_vm14, %v802_v35, %v898_v42  ;;  %v826_v58 = vrot.slane %v3412_v1, %v3231_v22  ;;  %v2496_v61 = vrot.slane %v3326_v46, 9  ;;  %v1361_v27 = vld [vmem:[%s4613_s4 + $0x258] sm:$0xff]  ;;  %2519 = vmatpush3.msra.mxu1 %v1296_v26 }
 0x1ec   :  { %v909_v56 = vsel %vm579_vm4, %v830_v29, %v908_v49  ;;  %v900_v60 = vsel %vm575_vm15, %v810_v25, %v899_v50  ;;  %v2497_v57 = vrot.slane %v3342_v63, 9  ;;  %v693_v2 = vcombine.low %v605_v44, %v606_v45  ;;  %2587 = vmatpush3.msra.mxu0 %v1361_v27  ;;  %v1373_v26 = vld [vmem:[%s4613_s4 + $0x2b8] sm:$0xff] }
 0x1ed   :  { %926 = vrot.lane.b32.xlu1 %v909_v56, %s2903_s11  ;;  %v901_v14 = vsel %vm577_vm3, %v818_v51, %v900_v60  ;;  %v2498_v11 = vrot.slane %v3359_v10, 9  ;;  %v2499_v12 = vrot.slane %v3349_v4, 9  ;;  %v694_v13 = vcombine.high %v605_v44, %v606_v45  ;;  %v1359_v60 = vld [vmem:[%s4613_s4 + $0x248] sm:$0xff] }
 0x1ee   :  { %v902_v8 = vsel %vm579_vm4, %v826_v58, %v901_v14  ;;  %v663_v16 = vmax.f32 %v3299_v32, %v2493_v3  ;;  %v665_v17 = vmax.f32 %v3302_v33, %v2495_v9  ;;  %v2500_v19 = vrot.slane %v3422_v7, 9  ;;  %v1311_v9 = vld [vmem:[%s4613_s4 + $0xc8] sm:$0xff] }
 0x1ef   :  { %924 = vrot.lane.b32.xlu0 %v902_v8, %s2903_s11  ;;  %v701_v20 = vrot.slane %v693_v2, %v3246_v37  ;;  %v664_v32 = vmax.f32 %v3309_v36, %v2494_v52  ;;  %v666_v3 = vmax.f32 %v3326_v46, %v2496_v61  ;;  %v708_v33 = vrot.slane %v694_v13, %v3246_v37  ;;  %v1376_v36 = vld [vmem:[%s4613_s4 + $0x2d0] sm:$0xff]  ;;  %v1295_v46 = vld [vmem:[%s4613_s4 + $0x48] sm:$0xff]  ;;  %v1309_v2 = vld [vmem:[%s4613_s4 + $0xb8] sm:$0xff] }
 0x1f0   :  { %v667_v29 = vmax.f32 %v3342_v63, %v2497_v57  ;;  %v668_v35 = vmax.f32 %v3359_v10, %v2498_v11  ;;  %v669_v25 = vmax.f32 %v3349_v4, %v2499_v12  ;;  %v1360_v63 = vld [vmem:[%s4613_s4 + $0x250] sm:$0xff]  ;;  %v670_v39 = vmax.f32 %v3422_v7, %v2500_v19  ;;  %2520 = vmatprep.subr.mxu1 %v1311_v9  ;;  %v1310_v4 = vld [vmem:[%s4613_s4 + $0xc0] sm:$0xff]  ;;  %v1375_v7 = vld [vmem:[%s4613_s4 + $0x2c8] sm:$0xff] }
 0x1f1   :  { %940 = vrot.lane.b32.xlu1 %v909_v56, %s2906_s10  ;;  %v709_v30 = vcombine.high %v701_v20, %v701_v20  ;;  %v715_v31 = vrot.slane %v701_v20, 1  ;;  %v3525_v34 = vmax.f32 %v663_v16, %v701_v20  ;;  %v710_v28 = vcombine.high %v708_v33, %v708_v33  ;;  %2588 = vmatprep.subr.mxu0 %v1376_v36  ;;  %v1293_v12 = vld [vmem:[%s4613_s4 + $0x38] sm:$0xff]  ;;  %v1358_v13 = vld [vmem:[%s4613_s4 + $0x240] sm:$0xff]  ;;  %v1308_v20 = vld [vmem:[%s4613_s4 + $0xb0] sm:$0xff] }
 0x1f2   :  { %v717_v38 = vrot.slane %v708_v33, 1  ;;  %v3547_v45 = vmax.f32 %v667_v29, %v708_v33  ;;  %2521 = vmatpush3.msra.mxu1 %v1295_v46  ;;  %2589 = vmatpush3.msra.mxu0 %v1360_v63  ;;  %v1292_v33 = vld [vmem:[%s4613_s4 + $0x30] sm:$0xff]  ;;  %v1357_v9 = vld [vmem:[%s4613_s4 + $0x238] sm:$0xff]  ;;  %v1307_v36 = vld [vmem:[%s4613_s4 + $0xa8] sm:$0xff]  ;;  %vm946_vm2 = vcmask 916480   ;;  %vm2473_vm6 = vcmask 654336  }
 0x1f3   :  { %938 = vrot.lane.b32.xlu0 %v902_v8, %s2906_s10  ;;  %v716_v40 = vrot.slane %v709_v30, 1  ;;  %v3540_v42 = vmax.f32 %v664_v32, %v715_v31  ;;  %v3542_v44 = vmax.f32 %v665_v17, %v709_v30  ;;  %v718_v10 = vrot.slane %v710_v28, 1  ;;  %2522 = vmatprep.subr.mxu1 %v1310_v4  ;;  %v1356_v4 = vld [vmem:[%s4613_s4 + $0x230] sm:$0xff] }
 0x1f4   :  { %v3549_v47 = vmax.f32 %v668_v35, %v717_v38  ;;  %v838_v48 = vrot.slane %v3525_v34, %v3258_v54  ;;  %v3558_v51 = vmax.f32 %v669_v25, %v710_v28  ;;  %v834_v56 = vrot.slane %v3525_v34, %v3231_v22  ;;  %2590 = vmatprep.subr.mxu0 %v1375_v7  ;;  %v1372_v28 = vld [vmem:[%s4613_s4 + $0x2b0] sm:$0xff]  ;;  %v1291_v38 = vld [vmem:[%s4613_s4 + $0x28] sm:$0xff] }
 0x1f5   :  { %v3556_v49 = vmax.f32 %v666_v3, %v716_v40  ;;  %v846_v50 = vrot.slane %v3540_v42, %v3258_v54  ;;  %v854_v52 = vrot.slane %v3542_v44, %v3258_v54  ;;  %v3567_v55 = vmax.f32 %v670_v39, %v718_v10  ;;  %2523 = vmatpush3.msra.mxu1 %v1294_v53  ;;  %v1371_v7 = vld [vmem:[%s4613_s4 + $0x2a8] sm:$0xff] }
 0x1f6   :  { %v842_v58 = vrot.slane %v3540_v42, %v3231_v22  ;;  %v850_v57 = vrot.slane %v3542_v44, %v3231_v22  ;;  %v870_v6 = vrot.slane %v3547_v45, %v3258_v54  ;;  %v878_v8 = vrot.slane %v3549_v47, %v3258_v54  ;;  %2591 = vmatpush3.msra.mxu0 %v1359_v60  ;;  %v1355_v53 = vld [vmem:[%s4613_s4 + $0x228] sm:$0xff]  ;;  %v1289_v60 = vld [vmem:[%s4613_s4 + $0x18] sm:$0xff] }
 0x1f7   :  { %v862_v61 = vrot.slane %v3556_v49, %v3258_v54  ;;  %v917_v62 = vsel %vm895_vm8, %v846_v50, %v838_v48  ;;  %v858_v14 = vrot.slane %v3556_v49, %v3231_v22  ;;  %v886_v15 = vrot.slane %v3558_v51, %v3258_v54  ;;  %2524 = vmatprep.subr.mxu1 %v1309_v2  ;;  %v1306_v48 = vld [vmem:[%s4613_s4 + $0xa0] sm:$0xff]  ;;  %v1353_v2 = vld [vmem:[%s4613_s4 + $0x218] sm:$0xff] }
 0x1f8   :  { %v918_v11 = vsel %vm569_vm12, %v854_v52, %v917_v62  ;;  %v894_v16 = vrot.slane %v3567_v55, %v3258_v54  ;;  %v910_v19 = vsel %vm895_vm8, %v842_v58, %v834_v56  ;;  %v866_v32 = vrot.slane %v3547_v45, %v3231_v22  ;;  %2592 = vmatprep.subr.mxu0 %v1374_v21  ;;  %v1290_v52 = vld [vmem:[%s4613_s4 + $0x20] sm:$0xff]  ;;  %v1305_v56 = vld [vmem:[%s4613_s4 + $0x98] sm:$0xff]  ;;  %v1304_v62 = vld [vmem:[%s4613_s4 + $0x90] sm:$0xff] }
 0x1f9   :  { %v919_v17 = vsel %vm571_vm13, %v862_v61, %v918_v11  ;;  %v911_v3 = vsel %vm569_vm12, %v850_v57, %v910_v19  ;;  %v874_v30 = vrot.slane %v3549_v47, %v3231_v22  ;;  %2525 = vmatpush3.msra.mxu1 %v1293_v12  ;;  %2593 = vmatpush3.msra.mxu0 %v1358_v13  ;;  %v1370_v58 = vld [vmem:[%s4613_s4 + $0x2a0] sm:$0xff]  ;;  %v1369_v57 = vld [vmem:[%s4613_s4 + $0x298] sm:$0xff]  ;;  %v1303_v21 = vld [vmem:[%s4613_s4 + $0x88] sm:$0xff] }
 0x1fa   :  { %v920_v27 = vsel %vm573_vm14, %v870_v6, %v919_v17  ;;  %v912_v31 = vsel %vm571_vm13, %v858_v14, %v911_v3  ;;  %v882_v35 = vrot.slane %v3558_v51, %v3231_v22  ;;  %2526 = vmatprep.subr.mxu1 %v1308_v20  ;;  %2594 = vmatprep.subr.mxu0 %v1373_v26  ;;  %v1354_v61 = vld [vmem:[%s4613_s4 + $0x220] sm:$0xff]  ;;  %v1288_v14 = vld [vmem:[%s4613_s4 + $0x10] sm:$0xff]  ;;  %v1367_v13 = vld [vmem:[%s4613_s4 + $0x288] sm:$0xff]  ;;  %vm2162_vm13 = vcmask 261120  }
 0x1fb   :  { %v921_v29 = vsel %vm575_vm15, %v878_v8, %v920_v27  ;;  %v913_v25 = vsel %vm573_vm14, %v866_v32, %v912_v31  ;;  %v890_v39 = vrot.slane %v3567_v55, %v3231_v22  ;;  %2527 = vmatpush3.msra.mxu1 %v1292_v33  ;;  %2595 = vmatpush3.msra.mxu0 %v1357_v9  ;;  %v1368_v6 = vld [vmem:[%s4613_s4 + $0x290] sm:$0xff]  ;;  %v1287_v8 = vld [vmem:[%s4613_s4 + $0x8] sm:$0xff]  ;;  %v1302_v12 = vld [vmem:[%s4613_s4 + $0x80] sm:$0xff]  ;;  %v2907_v27 = vmov 1  }
 0x1fc   :  { %v922_v46 = vsel %vm577_vm3, %v886_v15, %v921_v29  ;;  %v914_v40 = vsel %vm575_vm15, %v874_v30, %v913_v25  ;;  %2528 = vmatprep.subr.mxu1 %v1307_v36  ;;  %2596 = vmatprep.subr.mxu0 %v1372_v28  ;;  %v1352_v11 = vld [vmem:[%s4613_s4 + $0x210] sm:$0xff]  ;;  %v1286_v15 = vld [vmem:[%s4613_s4] sm:$0xff]  ;;  %v1349_v17 = vld [vmem:[%s4613_s4 + $0x1f8] sm:$0xff]  ;;  %v2908_v32 = vmov 0   ;;  %vm2164_vm14 = vcmask 523264  }
 0x1fd   :  { %v923_v63 = vsel %vm579_vm4, %v894_v16, %v922_v46  ;;  %v915_v10 = vsel %vm577_vm3, %v882_v35, %v914_v40  ;;  %2529 = vmatpush3.msra.mxu1 %v1291_v38  ;;  %2597 = vmatpush3.msra.mxu0 %v1356_v4  ;;  %v1351_v16 = vld [vmem:[%s4613_s4 + $0x208] sm:$0xff]  ;;  %v1366_v19 = vld [vmem:[%s4613_s4 + $0x280] sm:$0xff]  ;;  %v1445_v26 = vld [vmem:[%s4613_s4 + $0x4f8] sm:$0xff]  ;;  %vm2166_vm15 = vcmask 785408  }
 0x1fe   :  { %930 = vrot.lane.b32.xlu1 %v923_v63, %s2903_s11  ;;  %v916_v50 = vsel %vm579_vm4, %v890_v39, %v915_v10  ;;  %2530 = vmatprep.subr.mxu1 %v1306_v48  ;;  %v1350_v20 = vld [vmem:[%s4613_s4 + $0x200] sm:$0xff]  ;;  %vm2471_vm4 = vcmask 392192  }
 0x1ff   :  { %928 = vrot.lane.b32.xlu0 %v916_v50, %s2903_s11  ;;  %2598 = vmatprep.subr.mxu0 %v1371_v7  ;;  %v2109_v3 = vld [vmem:[%s4614_s1] sm:$0x3] }
 0x200   :  { %2531 = vmatpush3.msra.mxu1 %v1290_v52  ;;  %2599 = vmatpush3.msra.mxu0 %v1355_v53  ;;  %v2128_v33 = vld [vmem:[%s4615_s2] sm:$0x3]  ;;  %v2111_v9 = vmul.f32 0.1, %v2109_v3 }
 0x201   :  { %2532 = vmatprep.subr.mxu1 %v1305_v56  ;;  %2600 = vmatprep.subr.mxu0 %v1370_v58  ;;  %v3733_v31 = vld [vmem:[%s4616_s5 + $0x81] ss:$0 sm:$0xff] }
 0x202   :  { %944 = vrot.lane.b32.xlu1 %v923_v63, %s2906_s10  ;;  %2533 = vmatpush3.msra.mxu1 %v1289_v60  ;;  %v2112_v29 = vmul.f32 2.0, %v2111_v9 }
 0x203   :  { %942 = vrot.lane.b32.xlu0 %v916_v50, %s2906_s10  ;;  %2601 = vmatpush3.msra.mxu0 %v1354_v61  ;;  %s2909_s10 = smov 64  }
 0x204   :  { %2534 = vmatprep.subr.mxu1 %v1304_v62  ;;  %2602 = vmatprep.subr.mxu0 %v1369_v57  ;;  %v2502_v30 = vadd.f32 -1.0, %v2112_v29 }
 0x205   :  { %2535 = vmatpush3.msra.mxu1 %v1288_v14  ;;  %2603 = vmatpush3.msra.mxu0 %v1353_v2 }
 0x206   :  { %2536 = vmatprep.subr.mxu1 %v1303_v21  ;;  %2604 = vmatprep.subr.mxu0 %v1368_v6 }
 0x207   :  { %2537 = vmatpush3.msra.mxu1 %v1287_v8  ;;  %2605 = vmatpush3.msra.mxu0 %v1352_v11 }
 0x208   :  { %2538 = vmatprep.subr.mxu1 %v1302_v12  ;;  %2606 = vmatprep.subr.mxu0 %v1367_v13 }
 0x209   :  { %2539 = vmatpush3.msra.mxu1 %v1286_v15  ;;  %2607 = vmatpush3.msra.mxu0 %v1351_v16 }
 0x20a   :  { %2543 = vmatprep.subr.mxu1 %v1349_v17  ;;  %2608 = vmatprep.subr.mxu0 %v1366_v19 }
 0x20b   :  { %2609 = vmatpush3.msra.mxu0 %v1350_v20  ;;  %2888 = vset.pattern.permute.xlu1 %v2907_v27 }
 0x20c   :  { %2648 = vmatprep.subr.mxu0 %v1445_v26  ;;  %2887 = vset.pattern.permute.xlu0 %v2908_v32 }
 0x20d   :  { %2141 = vperm.xlu1 %2888, %v2128_v33   ;;  %2132 = vperm.xlu0 %2887, %v2128_v33  }
 0x211   :  { %2889 = vset.pattern.permute.xlu1 %v2908_v32  ;;  %2890 = vset.pattern.permute.xlu0 %v2907_v27 }
 0x212   :  { %2116 = vperm.xlu1 %2889, %v2502_v30   ;;  %2121 = vrot.lane.b32.xlu0 %v3733_v31, %s2909_s10 }
 0x25f   :  { %v927_v36 = vpop.permute.xlu1 %926 }
 0x261   :  { %v925_v46 = vpop.permute.xlu0 %924 }
 0x262   :  { %v932_v35 = vsel %vm161_vm5, %v925_v46, %v927_v36  ;;  %v936_v25 = vsel %vm161_vm5, -3e+38, %v925_v46 }
 0x263   :  { %v941_v28 = vpop.permute.xlu1 %940  ;;  %v955_v63 = vcombine.low %v936_v25, %v932_v35  ;;  %v956_v56 = vcombine.high %v936_v25, %v932_v35 }
 0x264   :  { %v951_v39 = vsel %vm946_vm2, %v941_v28, -3e+38 }
 0x265   :  { %v939_v38 = vpop.permute.xlu0 %938  ;;  %v963_v10 = vrot.slane %v955_v63, %v3246_v37  ;;  %v3751_v11 = vrot.slane %v956_v56, %v3246_v37 }
 0x266   :  { %v947_v40 = vsel %vm946_vm2, %v939_v38, %v941_v28 }
 0x267   :  { %v1033_v4 = vcombine.low %v947_v40, %v951_v39  ;;  %v991_v58 = vrot.slane %v963_v10, 1  ;;  %v3745_v62 = vcombine.high %v963_v10, %v963_v10  ;;  %v1015_v13 = vmax.f32 %v3393_v59, %v963_v10 }
 0x268   :  { %v1034_v26 = vcombine.high %v947_v40, %v951_v39  ;;  %v1019_v59 = vmax.f32 %v3402_v18, %v3751_v11 }
 0x269   :  { %v1041_v50 = vrot.slane %v1033_v4, %v3246_v37  ;;  %v1016_v15 = vmax.f32 %v3397_v0, %v991_v58  ;;  %v1017_v3 = vmax.f32 %v3400_v5, %v3745_v62  ;;  %v1348_v58 = vld [vmem:[%s4613_s4 + $0x1f0] sm:$0xff] }
 0x26a   :  { %v3780_v25 = vrot.slane %v1034_v26, %v3246_v37  ;;  %v1443_v26 = vld [vmem:[%s4613_s4 + $0x4e8] sm:$0xff] }
 0x26b   :  { %v1069_v6 = vrot.slane %v1041_v50, 1  ;;  %v3753_v12 = vcombine.high %v1041_v50, %v1041_v50  ;;  %v1093_v32 = vmax.f32 %v1015_v13, %v1041_v50 }
 0x26c   :  { %v3808_v56 = vmax.f32 %v1019_v59, %v3780_v25  ;;  %v1442_v59 = vld [vmem:[%s4613_s4 + $0x4e0] sm:$0xff] }
 0x26d   :  { %v3765_v9 = vmax.f32 %v1016_v15, %v1069_v6  ;;  %v1095_v30 = vmax.f32 %v1017_v3, %v3753_v12  ;;  %v1118_v38 = vrot.slane %v1093_v32, %v3258_v54  ;;  %v1347_v6 = vld [vmem:[%s4613_s4 + $0x1e8] sm:$0xff] }
 0x26e   :  { %v1206_v13 = vrot.slane %v3808_v56, %v3258_v54  ;;  %v1331_v15 = vld [vmem:[%s4613_s4 + $0x168] sm:$0xff] }
 0x26f   :  { %v1140_v39 = vrot.slane %v3765_v9, %v3258_v54  ;;  %v1162_v40 = vrot.slane %v1095_v30, %v3258_v54  ;;  %v1427_v3 = vld [vmem:[%s4613_s4 + $0x468] sm:$0xff] }
 0x270   :  { %v931_v48 = vpop.permute.xlu1 %930 }
 0x271   :  { %v929_v7 = vpop.permute.xlu0 %928 }
 0x272   :  { %v933_v52 = vsel %vm161_vm5, %v929_v7, %v931_v48  ;;  %v937_v53 = vsel %vm161_vm5, -3e+38, %v929_v7  ;;  %v1158_v48 = vrot.slane %v1095_v30, %v3231_v22  ;;  %v1426_v30 = vld [vmem:[%s4613_s4 + $0x460] sm:$0xff] }
 0x273   :  { %v973_v60 = vcombine.low %v937_v53, %v933_v52  ;;  %v974_v57 = vcombine.high %v937_v53, %v933_v52  ;;  %v1333_v53 = vld [vmem:[%s4613_s4 + $0x178] sm:$0xff] }
 0x274   :  { %v945_v61 = vpop.permute.xlu1 %944 }
 0x275   :  { %v981_v14 = vrot.slane %v973_v60, %v3246_v37  ;;  %v952_v2 = vsel %vm946_vm2, %v945_v61, -3e+38  ;;  %v943_v21 = vpop.permute.xlu0 %942  ;;  %v3760_v27 = vrot.slane %v974_v57, %v3246_v37 }
 0x276   :  { %v948_v8 = vsel %vm946_vm2, %v943_v21, %v945_v61 }
 0x277   :  { %v3757_v16 = vcombine.high %v981_v14, %v981_v14  ;;  %v995_v17 = vrot.slane %v981_v14, 1  ;;  %v1051_v19 = vcombine.low %v948_v8, %v952_v2  ;;  %v1052_v20 = vcombine.high %v948_v8, %v952_v2  ;;  %v1429_v2 = vld [vmem:[%s4613_s4 + $0x478] sm:$0xff]  ;;  %v1444_v8 = vld [vmem:[%s4613_s4 + $0x4f0] sm:$0xff] }
 0x278   :  { %v1023_v29 = vmax.f32 %v3525_v34, %v981_v14  ;;  %v1027_v18 = vmax.f32 %v3547_v45, %v3760_v27  ;;  %v1114_v34 = vrot.slane %v1093_v32, %v3231_v22  ;;  %v1332_v14 = vld [vmem:[%s4613_s4 + $0x170] sm:$0xff]  ;;  %v1330_v32 = vld [vmem:[%s4613_s4 + $0x160] sm:$0xff] }
 0x279   :  { %v1059_v33 = vrot.slane %v1051_v19, %v3246_v37  ;;  %v3770_v0 = vrot.slane %v1052_v20, %v3246_v37  ;;  %v1024_v35 = vmax.f32 %v3540_v42, %v995_v17  ;;  %v1025_v5 = vmax.f32 %v3542_v44, %v3757_v16  ;;  %v1428_v17 = vld [vmem:[%s4613_s4 + $0x470] sm:$0xff]  ;;  %v1346_v19 = vld [vmem:[%s4613_s4 + $0x1e0] sm:$0xff] }
 0x27b   :  { %v3774_v36 = vcombine.high %v1059_v33, %v1059_v33  ;;  %v1073_v46 = vrot.slane %v1059_v33, 1  ;;  %v1101_v28 = vmax.f32 %v1023_v29, %v1059_v33  ;;  %v3795_v45 = vmax.f32 %v1027_v18, %v3770_v0  ;;  %v1345_v33 = vld [vmem:[%s4613_s4 + $0x1d8] sm:$0xff] }
 0x27c   :  { %v1329_v29 = vld [vmem:[%s4613_s4 + $0x158] sm:$0xff] }
 0x27d   :  { %v3786_v63 = vmax.f32 %v1024_v35, %v1073_v46  ;;  %v1103_v42 = vmax.f32 %v1025_v5, %v3774_v36  ;;  %v1126_v44 = vrot.slane %v1101_v28, %v3258_v54  ;;  %v1122_v37 = vrot.slane %v1101_v28, %v3231_v22  ;;  %v1344_v46 = vld [vmem:[%s4613_s4 + $0x1d0] sm:$0xff]  ;;  %v1441_v35 = vld [vmem:[%s4613_s4 + $0x4d8] sm:$0xff]  ;;  %v1343_v28 = vld [vmem:[%s4613_s4 + $0x1c8] sm:$0xff] }
 0x27e   :  { %v1214_v21 = vrot.slane %v3795_v45, %v3258_v54  ;;  %v1328_v5 = vld [vmem:[%s4613_s4 + $0x150] sm:$0xff]  ;;  %v1425_v18 = vld [vmem:[%s4613_s4 + $0x458] sm:$0xff] }
 0x27f   :  { %v1148_v4 = vrot.slane %v3786_v63, %v3258_v54  ;;  %v1170_v10 = vrot.slane %v1103_v42, %v3258_v54  ;;  %v1166_v7 = vrot.slane %v1103_v42, %v3231_v22  ;;  %v1128_v50 = vsel %vm895_vm8, %v1126_v44, %v1118_v38  ;;  %v1440_v38 = vld [vmem:[%s4613_s4 + $0x4d0] sm:$0xff]  ;;  %v1342_v42 = vld [vmem:[%s4613_s4 + $0x1c0] sm:$0xff]  ;;  %v1439_v44 = vld [vmem:[%s4613_s4 + $0x4c8] sm:$0xff] }
 0x280   :  { %v1127_v52 = vsel %vm895_vm8, %v1122_v37, %v1114_v34  ;;  %1610 = vmatprep.mubr.f32.mxu1 %v1128_v50  ;;  %v1216_v20 = vsel %vm895_vm8, %v1214_v21, %v1206_v13  ;;  %v1327_v34 = vld [vmem:[%s4613_s4 + $0x148] sm:$0xff]  ;;  %v1326_v37 = vld [vmem:[%s4613_s4 + $0x140] sm:$0xff]  ;;  %v1340_v50 = vld [vmem:[%s4613_s4 + $0x1b0] sm:$0xff] }
 0x281   :  { %v1150_v60 = vsel %vm895_vm8, %v1148_v4, %v1140_v39  ;;  %v1172_v61 = vsel %vm895_vm8, %v1170_v10, %v1162_v40  ;;  %v1171_v57 = vsel %vm895_vm8, %v1166_v7, %v1158_v48  ;;  %1611 = vmatmul.mubr.f32.vlgmr.msra.gmra.mxu1 %v1127_v52  ;;  %v1424_v39 = vld [vmem:[%s4613_s4 + $0x450] sm:$0xff]  ;;  %v1423_v40 = vld [vmem:[%s4613_s4 + $0x448] sm:$0xff]  ;;  %v1341_v4 = vld [vmem:[%s4613_s4 + $0x1b8] sm:$0xff] }
 0x282   :  { %1750 = vmatprep.mubr.f32.mxu0 %v1172_v61  ;;  %2544 = vmatpush3.msra.mxu1 %v1333_v53  ;;  %v1438_v10 = vld [vmem:[%s4613_s4 + $0x4c0] sm:$0xff]  ;;  %v1325_v48 = vld [vmem:[%s4613_s4 + $0x138] sm:$0xff]  ;;  %v1324_v53 = vld [vmem:[%s4613_s4 + $0x130] sm:$0xff] }
 0x283   :  { %1680 = vmatprep.mubr.f32.mxu1 %v1150_v60  ;;  %2545 = vmatprep.subr.mxu1 %v1348_v58  ;;  %v1422_v7 = vld [vmem:[%s4613_s4 + $0x440] sm:$0xff]  ;;  %v1437_v52 = vld [vmem:[%s4613_s4 + $0x4b8] sm:$0xff]  ;;  %v1339_v60 = vld [vmem:[%s4613_s4 + $0x1a8] sm:$0xff] }
 0x284   :  { %1751 = vmatmul.mubr.f32.vlgmr.msra.gmra.mxu0 %v1171_v57  ;;  %2546 = vmatpush3.msra.mxu1 %v1332_v14  ;;  %v1421_v58 = vld [vmem:[%s4613_s4 + $0x438] sm:$0xff]  ;;  %v1436_v61 = vld [vmem:[%s4613_s4 + $0x4b0] sm:$0xff]  ;;  %v1323_v57 = vld [vmem:[%s4613_s4 + $0x128] sm:$0xff]  ;;  %v996_v14 = vrot.slane %v3757_v16, 1 }
 0x285   :  { %2649 = vmatpush3.msra.mxu0 %v1429_v2  ;;  %2547 = vmatprep.subr.mxu1 %v1347_v6  ;;  %v1420_v2 = vld [vmem:[%s4613_s4 + $0x430] sm:$0xff]  ;;  %v1338_v21 = vld [vmem:[%s4613_s4 + $0x1a0] sm:$0xff]  ;;  %v1435_v6 = vld [vmem:[%s4613_s4 + $0x4a8] sm:$0xff] }
 0x286   :  { %2650 = vmatprep.subr.mxu0 %v1444_v8  ;;  %1890 = vmatprep.mubr.f32.mxu0 %v1216_v20  ;;  %v1322_v16 = vld [vmem:[%s4613_s4 + $0x120] sm:$0xff]  ;;  %v992_v8 = vrot.slane %v3745_v62, 1  ;;  %v1419_v13 = vld [vmem:[%s4613_s4 + $0x428] sm:$0xff]  ;;  %v1321_v62 = vld [vmem:[%s4613_s4 + $0x118] sm:$0xff]  ;;  %v3961_v20 = vcombine.high %v3760_v27, %v3760_v27 }
 0x287   :  { %2548 = vmatpush3.msra.mxu1 %v1331_v15  ;;  %2651 = vmatpush3.msra.mxu0 %v1428_v17  ;;  %v1337_v15 = vld [vmem:[%s4613_s4 + $0x198] sm:$0xff]  ;;  %v1074_v17 = vrot.slane %v3774_v36, 1  ;;  %v1418_v36 = vld [vmem:[%s4613_s4 + $0x420] sm:$0xff] }
 0x288   :  { %2549 = vmatprep.subr.mxu1 %v1346_v19  ;;  %2652 = vmatprep.subr.mxu0 %v1443_v26  ;;  %v1434_v19 = vld [vmem:[%s4613_s4 + $0x4a0] sm:$0xff]  ;;  %v1336_v26 = vld [vmem:[%s4613_s4 + $0x190] sm:$0xff] }
 0x289   :  { %2550 = vmatpush3.msra.mxu1 %v1330_v32  ;;  %2653 = vmatpush3.msra.mxu0 %v1427_v3  ;;  %v1026_v32 = vmax.f32 %v3556_v49, %v996_v14  ;;  %v1070_v3 = vrot.slane %v3753_v12, 1  ;;  %v1417_v49 = vld [vmem:[%s4613_s4 + $0x418] sm:$0xff]  ;;  %v1335_v12 = vld [vmem:[%s4613_s4 + $0x188] sm:$0xff] }
 0x28a   :  { %2551 = vmatprep.subr.mxu1 %v1345_v33  ;;  %2654 = vmatprep.subr.mxu0 %v1442_v59  ;;  %v3973_v33 = vcombine.high %v3751_v11, %v3751_v11  ;;  %v1433_v59 = vld [vmem:[%s4613_s4 + $0x498] sm:$0xff] }
 0x28b   :  { %2552 = vmatpush3.msra.mxu1 %v1329_v29  ;;  %2655 = vmatpush3.msra.mxu0 %v1426_v30  ;;  %v1320_v29 = vld [vmem:[%s4613_s4 + $0x110] sm:$0xff]  ;;  %v3983_v30 = vcombine.high %v3770_v0, %v3770_v0 }
 0x28c   :  { %2553 = vmatprep.subr.mxu1 %v1344_v46  ;;  %2656 = vmatprep.subr.mxu0 %v1441_v35  ;;  %v1018_v46 = vmax.f32 %v3410_v43, %v992_v8  ;;  %v3992_v35 = vmax.f32 %v1026_v32, %v1074_v17  ;;  %v1416_v43 = vld [vmem:[%s4613_s4 + $0x410] sm:$0xff]  ;;  %v1409_v32 = vld [vmem:[%s4613_s4 + $0x3d8] sm:$0xff] }
 0x28d   :  { %2554 = vmatpush3.msra.mxu1 %v1328_v5  ;;  %2657 = vmatpush3.msra.mxu0 %v1425_v18  ;;  %v3996_v5 = vcombine.high %v3780_v25, %v3780_v25  ;;  %v1432_v18 = vld [vmem:[%s4613_s4 + $0x490] sm:$0xff] }
 0x28e   :  { %2555 = vmatprep.subr.mxu1 %v1343_v28  ;;  %2658 = vmatprep.subr.mxu0 %v1440_v38  ;;  %v1319_v28 = vld [vmem:[%s4613_s4 + $0x108] sm:$0xff]  ;;  %v1334_v38 = vld [vmem:[%s4613_s4 + $0x180] sm:$0xff]  ;;  %v1508_v8 = vld [vmem:[%s4613_s4 + $0x6f0] sm:$0xff] }
 0x28f   :  { %2556 = vmatpush3.msra.mxu1 %v1327_v34  ;;  %2659 = vmatpush3.msra.mxu0 %v1424_v39  ;;  %v1144_v34 = vrot.slane %v3786_v63, %v3231_v22  ;;  %v4012_v39 = vmax.f32 %v1018_v46, %v1070_v3  ;;  %v1415_v63 = vld [vmem:[%s4613_s4 + $0x408] sm:$0xff]  ;;  %v1492_v17 = vld [vmem:[%s4613_s4 + $0x670] sm:$0xff]  ;;  %v1506_v3 = vld [vmem:[%s4613_s4 + $0x6e0] sm:$0xff] }
 0x290   :  { %2557 = vmatprep.subr.mxu1 %v1342_v42  ;;  %2660 = vmatprep.subr.mxu0 %v1439_v44  ;;  %v1029_v42 = vmax.f32 %v3558_v51, %v3961_v20  ;;  %v1431_v44 = vld [vmem:[%s4613_s4 + $0x488] sm:$0xff]  ;;  %v1136_v51 = vrot.slane %v3765_v9, %v3231_v22  ;;  %v1392_v46 = vld [vmem:[%s4613_s4 + $0x350] sm:$0xff] }
 0x291   :  { %2558 = vmatpush3.msra.mxu1 %v1326_v37  ;;  %2661 = vmatpush3.msra.mxu0 %v1423_v40  ;;  %v1318_v37 = vld [vmem:[%s4613_s4 + $0x100] sm:$0xff]  ;;  %v1021_v40 = vmax.f32 %v3406_v41, %v3973_v33  ;;  %v1413_v41 = vld [vmem:[%s4613_s4 + $0x3f8] sm:$0xff] }
 0x292   :  { %2559 = vmatprep.subr.mxu1 %v1341_v4  ;;  %2662 = vmatprep.subr.mxu0 %v1438_v10  ;;  %v1192_v4 = vrot.slane %v3992_v35, %v3258_v54  ;;  %v4032_v10 = vmax.f32 %v1029_v42, %v3983_v30  ;;  %v1149_v9 = vsel %vm895_vm8, %v1144_v34, %v1136_v51  ;;  %v1488_v34 = vld [vmem:[%s4613_s4 + $0x650] sm:$0xff]  ;;  %v1406_v42 = vld [vmem:[%s4613_s4 + $0x3c0] sm:$0xff] }
 0x293   :  { %2560 = vmatpush3.msra.mxu1 %v1325_v48  ;;  %2663 = vmatpush3.msra.mxu0 %v1422_v7  ;;  %v1430_v48 = vld [vmem:[%s4613_s4 + $0x480] sm:$0xff]  ;;  %v4041_v7 = vmax.f32 %v1021_v40, %v3996_v5  ;;  %v1487_v40 = vld [vmem:[%s4613_s4 + $0x648] sm:$0xff] }
 0x294   :  { %2561 = vmatprep.subr.mxu1 %v1340_v50  ;;  %2664 = vmatprep.subr.mxu0 %v1437_v52  ;;  %v1397_v50 = vld [vmem:[%s4613_s4 + $0x378] sm:$0xff]  ;;  %v1184_v52 = vrot.slane %v4012_v39, %v3258_v54  ;;  %v1258_v14 = vrot.slane %v4032_v10, %v3258_v54  ;;  %v1502_v51 = vld [vmem:[%s4613_s4 + $0x6c0] sm:$0xff] }
 0x295   :  { %2562 = vmatpush3.msra.mxu1 %v1324_v53  ;;  %2665 = vmatpush3.msra.mxu0 %v1421_v58  ;;  %v1210_v53 = vrot.slane %v3795_v45, %v3231_v22  ;;  %v1414_v58 = vld [vmem:[%s4613_s4 + $0x400] sm:$0xff]  ;;  %v1509_v45 = vld [vmem:[%s4613_s4 + $0x6f8] sm:$0xff] }
 0x296   :  { %2563 = vmatprep.subr.mxu1 %v1339_v60  ;;  %2666 = vmatprep.subr.mxu0 %v1436_v61  ;;  %v1412_v60 = vld [vmem:[%s4613_s4 + $0x3f0] sm:$0xff]  ;;  %v1194_v61 = vsel %vm895_vm8, %v1192_v4, %v1184_v52  ;;  %v1389_v4 = vld [vmem:[%s4613_s4 + $0x338] sm:$0xff] }
 0x297   :  { %2564 = vmatpush3.msra.mxu1 %v1323_v57  ;;  %2667 = vmatpush3.msra.mxu0 %v1420_v2  ;;  %v1202_v57 = vrot.slane %v3808_v56, %v3231_v22  ;;  %v1396_v2 = vld [vmem:[%s4613_s4 + $0x370] sm:$0xff]  ;;  %v1485_v52 = vld [vmem:[%s4613_s4 + $0x638] sm:$0xff] }
 0x298   :  { %2565 = vmatprep.subr.mxu1 %v1338_v21  ;;  %2668 = vmatprep.subr.mxu0 %v1435_v6  ;;  %v1493_v21 = vld [vmem:[%s4613_s4 + $0x678] sm:$0xff]  ;;  %v1250_v6 = vrot.slane %v4041_v7, %v3258_v54 }
 0x299   :  { %2566 = vmatpush3.msra.mxu1 %v1322_v16  ;;  %2669 = vmatpush3.msra.mxu0 %v1419_v13  ;;  %v1215_v56 = vsel %vm895_vm8, %v1210_v53, %v1202_v57  ;;  %v1411_v16 = vld [vmem:[%s4613_s4 + $0x3e8] sm:$0xff]  ;;  %v1484_v57 = vld [vmem:[%s4613_s4 + $0x630] sm:$0xff] }
 0x29a   :  { %2567 = vmatprep.subr.mxu1 %v1337_v15  ;;  %2670 = vmatprep.subr.mxu0 %v1434_v19  ;;  %v1395_v13 = vld [vmem:[%s4613_s4 + $0x368] sm:$0xff]  ;;  %v1260_v15 = vsel %vm895_vm8, %v1258_v14, %v1250_v6  ;;  %v1410_v19 = vld [vmem:[%s4613_s4 + $0x3e0] sm:$0xff]  ;;  %v1401_v6 = vld [vmem:[%s4613_s4 + $0x398] sm:$0xff] }
 0x29b   :  { %2568 = vmatpush3.msra.mxu1 %v1321_v62  ;;  %2671 = vmatpush3.msra.mxu0 %v1418_v36  ;;  %v1507_v62 = vld [vmem:[%s4613_s4 + $0x6e8] sm:$0xff]  ;;  %v1394_v36 = vld [vmem:[%s4613_s4 + $0x360] sm:$0xff] }
 0x29c   :  { %2569 = vmatprep.subr.mxu1 %v1336_v26  ;;  %2672 = vmatprep.subr.mxu0 %v1433_v59  ;;  %v1491_v26 = vld [vmem:[%s4613_s4 + $0x668] sm:$0xff]  ;;  %v1393_v59 = vld [vmem:[%s4613_s4 + $0x358] sm:$0xff] }
 0x29d   :  { %2570 = vmatpush3.msra.mxu1 %v1320_v29  ;;  %2673 = vmatpush3.msra.mxu0 %v1417_v49  ;;  %v1490_v29 = vld [vmem:[%s4613_s4 + $0x660] sm:$0xff]  ;;  %v1408_v49 = vld [vmem:[%s4613_s4 + $0x3d0] sm:$0xff]  ;;  %v1403_v53 = vld [vmem:[%s4613_s4 + $0x3a8] sm:$0xff] }
 0x29e   :  { %2571 = vmatprep.subr.mxu1 %v1335_v12  ;;  %2674 = vmatprep.subr.mxu0 %v1432_v18  ;;  %v1505_v12 = vld [vmem:[%s4613_s4 + $0x6d8] sm:$0xff]  ;;  %v1499_v14 = vld [vmem:[%s4613_s4 + $0x6a8] sm:$0xff] }
 0x29f   :  { %2572 = vmatpush3.msra.mxu1 %v1319_v28  ;;  %2675 = vmatpush3.msra.mxu0 %v1416_v43  ;;  %v1489_v18 = vld [vmem:[%s4613_s4 + $0x658] sm:$0xff]  ;;  %v1407_v28 = vld [vmem:[%s4613_s4 + $0x3c8] sm:$0xff]  ;;  %v1504_v43 = vld [vmem:[%s4613_s4 + $0x6d0] sm:$0xff] }
 0x2a0   :  { %2573 = vmatprep.subr.mxu1 %v1334_v38  ;;  %2676 = vmatprep.subr.mxu0 %v1431_v44  ;;  %v1391_v38 = vld [vmem:[%s4613_s4 + $0x348] sm:$0xff] }
 0x2a1   :  { %2574 = vmatpush3.msra.mxu1 %v1318_v37  ;;  %2677 = vmatpush3.msra.mxu0 %v1415_v63  ;;  %v1503_v44 = vld [vmem:[%s4613_s4 + $0x6c8] sm:$0xff]  ;;  %v1390_v37 = vld [vmem:[%s4613_s4 + $0x340] sm:$0xff]  ;;  %v1405_v63 = vld [vmem:[%s4613_s4 + $0x3b8] sm:$0xff] }
 0x2a2   :  { %1681 = vmatmul.mubr.f32.vlgmr.msra.gmra.mxu1 %v1149_v9  ;;  %2613 = vmatprep.subr.mxu1 %v1413_v41  ;;  %v1486_v41 = vld [vmem:[%s4613_s4 + $0x640] sm:$0xff]  ;;  %v1501_v9 = vld [vmem:[%s4613_s4 + $0x6b8] sm:$0xff] }
 0x2a3   :  { %2678 = vmatprep.subr.mxu0 %v1430_v48  ;;  %2614 = vmatpush3.msra.mxu1 %v1397_v50  ;;  %v1404_v48 = vld [vmem:[%s4613_s4 + $0x3b0] sm:$0xff] }
 0x2a4   :  { %1820 = vmatprep.mubr.f32.mxu1 %v1194_v61  ;;  %2679 = vmatpush3.msra.mxu0 %v1414_v58  ;;  %v1388_v50 = vld [vmem:[%s4613_s4 + $0x330] sm:$0xff]  ;;  %v997_v61 = vrot.slane %v3760_v27, 1  ;;  %v1386_v27 = vld [vmem:[%s4613_s4 + $0x320] sm:$0xff] }
 0x2a5   :  { %2615 = vmatprep.subr.mxu1 %v1412_v60  ;;  %1891 = vmatmul.mubr.f32.vlgmr.msra.gmra.mxu0 %v1215_v56  ;;  %v1500_v58 = vld [vmem:[%s4613_s4 + $0x6b0] sm:$0xff]  ;;  %v1387_v60 = vld [vmem:[%s4613_s4 + $0x328] sm:$0xff] }
 0x2a6   :  { %2718 = vmatprep.subr.mxu0 %v1509_v45  ;;  %2616 = vmatpush3.msra.mxu1 %v1396_v2  ;;  %v1402_v45 = vld [vmem:[%s4613_s4 + $0x3a0] sm:$0xff]  ;;  %v993_v2 = vrot.slane %v3751_v11, 1  ;;  %v1483_v56 = vld [vmem:[%s4613_s4 + $0x628] sm:$0xff]  ;;  %v1385_v11 = vld [vmem:[%s4613_s4 + $0x318] sm:$0xff] }
 0x2a7   :  { %2719 = vmatpush3.msra.mxu0 %v1493_v21  ;;  %2030 = vmatprep.mubr.f32.mxu0 %v1260_v15  ;;  %v1075_v21 = vrot.slane %v3770_v0, 1  ;;  %v1071_v0 = vrot.slane %v3780_v25, 1  ;;  %v1028_v15 = vmax.f32 %v3549_v47, %v997_v61  ;;  %v1384_v25 = vld [vmem:[%s4613_s4 + $0x310] sm:$0xff]  ;;  %v1399_v47 = vld [vmem:[%s4613_s4 + $0x388] sm:$0xff] }
 0x2a8   :  { %2617 = vmatprep.subr.mxu1 %v1411_v16  ;;  %2720 = vmatprep.subr.mxu0 %v1508_v8  ;;  %v1498_v16 = vld [vmem:[%s4613_s4 + $0x6a0] sm:$0xff]  ;;  %v1456_v61 = vld [vmem:[%s4613_s4 + $0x550] sm:$0xff] }
 0x2a9   :  { %2618 = vmatpush3.msra.mxu1 %v1395_v13  ;;  %2721 = vmatpush3.msra.mxu0 %v1492_v17  ;;  %v1482_v8 = vld [vmem:[%s4613_s4 + $0x620] sm:$0xff]  ;;  %v1400_v13 = vld [vmem:[%s4613_s4 + $0x390] sm:$0xff]  ;;  %v1497_v17 = vld [vmem:[%s4613_s4 + $0x698] sm:$0xff] }
 0x2aa   :  { %2619 = vmatprep.subr.mxu1 %v1410_v19  ;;  %2722 = vmatprep.subr.mxu0 %v1507_v62  ;;  %v1481_v19 = vld [vmem:[%s4613_s4 + $0x618] sm:$0xff]  ;;  %v1020_v62 = vmax.f32 %v3404_v23, %v993_v2  ;;  %v1398_v23 = vld [vmem:[%s4613_s4 + $0x380] sm:$0xff] }
 0x2ab   :  { %2620 = vmatpush3.msra.mxu1 %v1394_v36  ;;  %2723 = vmatpush3.msra.mxu0 %v1491_v26  ;;  %v4228_v36 = vmax.f32 %v1028_v15, %v1075_v21  ;;  %v1496_v26 = vld [vmem:[%s4613_s4 + $0x690] sm:$0xff]  ;;  %v1470_v21 = vld [vmem:[%s4613_s4 + $0x5c0] sm:$0xff] }
 0x2ac   :  { %2621 = vmatprep.subr.mxu1 %v1409_v32  ;;  %2724 = vmatprep.subr.mxu0 %v1506_v3  ;;  %v1383_v32 = vld [vmem:[%s4613_s4 + $0x308] sm:$0xff]  ;;  %v1480_v3 = vld [vmem:[%s4613_s4 + $0x610] sm:$0xff] }
 0x2ad   :  { %2622 = vmatpush3.msra.mxu1 %v1393_v59  ;;  %2725 = vmatpush3.msra.mxu0 %v1490_v29  ;;  %v1188_v59 = vrot.slane %v3992_v35, %v3231_v22  ;;  %v4244_v29 = vmax.f32 %v1020_v62, %v1071_v0  ;;  %v1180_v35 = vrot.slane %v4012_v39, %v3231_v22  ;;  %v1461_v39 = vld [vmem:[%s4613_s4 + $0x578] sm:$0xff]  ;;  %v1468_v15 = vld [vmem:[%s4613_s4 + $0x5b0] sm:$0xff] }
 0x2ae   :  { %2623 = vmatprep.subr.mxu1 %v1408_v49  ;;  %2726 = vmatprep.subr.mxu0 %v1505_v12  ;;  %v1495_v49 = vld [vmem:[%s4613_s4 + $0x688] sm:$0xff]  ;;  %v1382_v12 = vld [vmem:[%s4613_s4 + $0x300] sm:$0xff]  ;;  %v1453_v0 = vld [vmem:[%s4613_s4 + $0x538] sm:$0xff] }
 0x2af   :  { %2624 = vmatpush3.msra.mxu1 %v1392_v46  ;;  %2727 = vmatpush3.msra.mxu0 %v1489_v18  ;;  %v1479_v46 = vld [vmem:[%s4613_s4 + $0x608] sm:$0xff]  ;;  %v1236_v18 = vrot.slane %v4228_v36, %v3258_v54 }
 0x2b0   :  { %2625 = vmatprep.subr.mxu1 %v1407_v28  ;;  %2728 = vmatprep.subr.mxu0 %v1504_v43  ;;  %v1477_v28 = vld [vmem:[%s4613_s4 + $0x5f8] sm:$0xff]  ;;  %v1494_v43 = vld [vmem:[%s4613_s4 + $0x680] sm:$0xff] }
 0x2b1   :  { %2626 = vmatpush3.msra.mxu1 %v1391_v38  ;;  %2729 = vmatpush3.msra.mxu0 %v1488_v34  ;;  %v1193_v38 = vsel %vm895_vm8, %v1188_v59, %v1180_v35  ;;  %v1228_v34 = vrot.slane %v4244_v29, %v3258_v54  ;;  %v994_v59 = vrot.slane %v3973_v33, 1  ;;  %v1449_v35 = vld [vmem:[%s4613_s4 + $0x518] sm:$0xff] }
 0x2b2   :  { %2627 = vmatprep.subr.mxu1 %v1406_v42  ;;  %2730 = vmatprep.subr.mxu0 %v1503_v44  ;;  %v1254_v42 = vrot.slane %v4032_v10, %v3231_v22  ;;  %v1478_v44 = vld [vmem:[%s4613_s4 + $0x600] sm:$0xff]  ;;  %v1460_v10 = vld [vmem:[%s4613_s4 + $0x570] sm:$0xff] }
 0x2b3   :  { %2628 = vmatpush3.msra.mxu1 %v1390_v37  ;;  %2731 = vmatpush3.msra.mxu0 %v1487_v40  ;;  %v1476_v37 = vld [vmem:[%s4613_s4 + $0x5f0] sm:$0xff]  ;;  %v1238_v40 = vsel %vm895_vm8, %v1236_v18, %v1228_v34  ;;  %v1072_v18 = vrot.slane %v3996_v5, 1  ;;  %v1447_v5 = vld [vmem:[%s4613_s4 + $0x508] sm:$0xff]  ;;  %v1462_v34 = vld [vmem:[%s4613_s4 + $0x580] sm:$0xff] }
 0x2b4   :  { %2629 = vmatprep.subr.mxu1 %v1405_v63  ;;  %2732 = vmatprep.subr.mxu0 %v1502_v51  ;;  %v1246_v63 = vrot.slane %v4041_v7, %v3231_v22  ;;  %v1475_v51 = vld [vmem:[%s4613_s4 + $0x5e8] sm:$0xff]  ;;  %v1474_v7 = vld [vmem:[%s4613_s4 + $0x5e0] sm:$0xff] }
 0x2b5   :  { %2630 = vmatpush3.msra.mxu1 %v1389_v4  ;;  %2733 = vmatpush3.msra.mxu0 %v1486_v41  ;;  %v1459_v41 = vld [vmem:[%s4613_s4 + $0x568] sm:$0xff] }
 0x2b6   :  { %2631 = vmatprep.subr.mxu1 %v1404_v48  ;;  %2734 = vmatprep.subr.mxu0 %v1501_v9  ;;  %v1259_v4 = vsel %vm895_vm8, %v1254_v42, %v1246_v63  ;;  %v2129_v48 = vld [vmem:[%s4616_s5 + $0x82] sm:$0x3] }
 0x2b7   :  { %2632 = vmatpush3.msra.mxu1 %v1388_v50  ;;  %2735 = vmatpush3.msra.mxu0 %v1485_v52  ;;  %v1458_v9 = vld [vmem:[%s4613_s4 + $0x560] sm:$0xff]  ;;  %v1473_v50 = vld [vmem:[%s4613_s4 + $0x5d8] sm:$0xff] }
 0x2b8   :  { %2633 = vmatprep.subr.mxu1 %v1403_v53  ;;  %2736 = vmatprep.subr.mxu0 %v1500_v58  ;;  %v1457_v52 = vld [vmem:[%s4613_s4 + $0x558] sm:$0xff]  ;;  %v4308_v53 = vrot.slane %v2129_v48, %v3236_v24  ;;  %v4311_v58 = vrot.slane %v2129_v48, %v3231_v22  ;;  %v2142_v24 = vpop.permute.xlu1 %2141  ;;  %v1446_v42 = vld [vmem:[%s4613_s4 + $0x500] sm:$0xff] }
 0x2b9   :  { %2634 = vmatpush3.msra.mxu1 %v1387_v60  ;;  %2737 = vmatpush3.msra.mxu0 %v1484_v57  ;;  %v1472_v60 = vld [vmem:[%s4613_s4 + $0x5d0] sm:$0xff]  ;;  %v1471_v57 = vld [vmem:[%s4613_s4 + $0x5c8] sm:$0xff]  ;;  %v1522_v48 = vld [vmem:[%s4613_s4 + $0x760] sm:$0xff] }
 0x2ba   :  { %2635 = vmatprep.subr.mxu1 %v1402_v45  ;;  %2738 = vmatprep.subr.mxu0 %v1499_v14  ;;  %v2133_v45 = vpop.permute.xlu0 %2132  ;;  %v1455_v14 = vld [vmem:[%s4613_s4 + $0x548] sm:$0xff] }
 0x2bb   :  { %2636 = vmatpush3.msra.mxu1 %v1386_v27  ;;  %2739 = vmatpush3.msra.mxu0 %v1483_v56  ;;  %v2148_v27 = vmul.f32 %v4308_v53, %v2142_v24  ;;  %v2139_v2 = vmul.f32 %v4311_v58, %v2133_v45  ;;  %v1454_v56 = vld [vmem:[%s4613_s4 + $0x540] sm:$0xff] }
 0x2bc   :  { %2637 = vmatprep.subr.mxu1 %v1401_v6  ;;  %2740 = vmatprep.subr.mxu0 %v1498_v16  ;;  %v1469_v16 = vld [vmem:[%s4613_s4 + $0x5b8] sm:$0xff]  ;;  %v1534_v24 = vld [vmem:[%s4613_s4 + $0x7c0] sm:$0xff] }
 0x2bd   :  { %2638 = vmatpush3.msra.mxu1 %v1385_v11  ;;  %2741 = vmatpush3.msra.mxu0 %v1482_v8  ;;  %v2149_v6 = vadd.f32 %v2148_v27, %v2139_v2  ;;  %v1518_v45 = vld [vmem:[%s4613_s4 + $0x740] sm:$0xff]  ;;  %v1517_v27 = vld [vmem:[%s4613_s4 + $0x738] sm:$0xff]  ;;  %v1532_v2 = vld [vmem:[%s4613_s4 + $0x7b0] sm:$0xff] }
 0x2be   :  { %2639 = vmatprep.subr.mxu1 %v1400_v13  ;;  %2742 = vmatprep.subr.mxu0 %v1497_v17  ;;  %v2122_v11 = vpop.permute.xlu0 %2121  ;;  %v2117_v13 = vpop.permute.xlu1 %2116 }
 0x2bf   :  { %2640 = vmatpush3.msra.mxu1 %v1384_v25  ;;  %2743 = vmatpush3.msra.mxu0 %v1481_v19  ;;  %v2150_v8 = vadd.f32 %v2149_v6, %v2122_v11  ;;  %v2119_v17 = vmul.f32 %v3733_v31, %v2117_v13  ;;  %v1452_v25 = vld [vmem:[%s4613_s4 + $0x530] sm:$0xff]  ;;  %v1451_v31 = vld [vmem:[%s4613_s4 + $0x528] sm:$0xff] }
 0x2c0   :  { %2641 = vmatprep.subr.mxu1 %v1399_v47  ;;  %2744 = vmatprep.subr.mxu0 %v1496_v26  ;;  %v1467_v47 = vld [vmem:[%s4613_s4 + $0x5a8] sm:$0xff]  ;;  %v998_v26 = vrot.slane %v3961_v20, 1  ;;  %v1450_v20 = vld [vmem:[%s4613_s4 + $0x520] sm:$0xff]  ;;  %v1528_v13 = vld [vmem:[%s4613_s4 + $0x790] sm:$0xff] }
 0x2c1   :  { %2642 = vmatpush3.msra.mxu1 %v1383_v32  ;;  %2745 = vmatpush3.msra.mxu0 %v1480_v3  ;;  %vm2151_vm9 = vcmp.gt.f32.partialorder %v2150_v8, 0.0  ;;  %v2152_v19 = vmul.f32 0.01, %v2150_v8  ;;  %v2124_v62 = vadd.f32 %v2122_v11, %v2119_v17  ;;  %v1466_v3 = vld [vmem:[%s4613_s4 + $0x5a0] sm:$0xff]  ;;  %v1515_v6 = vld [vmem:[%s4613_s4 + $0x728] sm:$0xff] }
 0x2c2   :  { %2643 = vmatprep.subr.mxu1 %v1398_v23  ;;  %2746 = vmatprep.subr.mxu0 %v1495_v49  ;;  %v1076_v49 = vrot.slane %v3983_v30, 1  ;;  %v1030_v33 = vmax.f32 %v3567_v55, %v998_v26  ;;  %v1464_v30 = vld [vmem:[%s4613_s4 + $0x590] sm:$0xff]  ;;  %v1463_v55 = vld [vmem:[%s4613_s4 + $0x588] sm:$0xff]  ;;  %v1514_v11 = vld [vmem:[%s4613_s4 + $0x720] sm:$0xff] }
 0x2c3   :  { %2644 = vmatpush3.msra.mxu1 %v1382_v12  ;;  %2747 = vmatpush3.msra.mxu0 %v1479_v46  ;;  %v2153_v32 = vsel %vm2151_vm9, %v2150_v8, %v2152_v19  ;;  %vm2125_vm10 = vcmp.gt.f32.partialorder %v2124_v62, 0.0  ;;  %v2126_v23 = vmul.f32 0.01, %v2124_v62  ;;  %v1465_v12 = vld [vmem:[%s4613_s4 + $0x598] sm:$0xff]  ;;  %v1527_v17 = vld [vmem:[%s4613_s4 + $0x788] sm:$0xff]  ;;  %v1526_v19 = vld [vmem:[%s4613_s4 + $0x780] sm:$0xff] }
 0x2c4   :  { %1821 = vmatmul.mubr.f32.vlgmr.msra.gmra.mxu1 %v1193_v38  ;;  %2683 = vmatprep.subr.mxu1 %v1477_v28  ;;  %v1448_v28 = vld [vmem:[%s4613_s4 + $0x510] sm:$0xff]  ;;  %v4378_v38 = vmax.f32 %v1030_v33, %v1076_v49  ;;  %v1513_v8 = vld [vmem:[%s4613_s4 + $0x718] sm:$0xff] }
 0x2c5   :  { %2748 = vmatprep.subr.mxu0 %v1494_v43  ;;  %2684 = vmatpush3.msra.mxu1 %v1461_v39  ;;  %v2127_v46 = vsel %vm2125_vm10, %v2124_v62, %v2126_v23  ;;  %v1022_v43 = vmax.f32 %v3412_v1, %v994_v59  ;;  %v1232_v1 = vrot.slane %v4228_v36, %v3231_v22  ;;  %v1525_v36 = vld [vmem:[%s4613_s4 + $0x778] sm:$0xff]  ;;  %v1510_v62 = vld [vmem:[%s4613_s4 + $0x700] sm:$0xff]  ;;  %v2182_v23 = vld [vmem:[%s4616_s5 + $0x70] sm:$0xff] }
 0x2c6   :  { %1960 = vmatprep.mubr.f32.mxu1 %v1238_v40  ;;  %2749 = vmatpush3.msra.mxu0 %v1478_v44  ;;  %v1280_v44 = vrot.slane %v4378_v38, %v3258_v54  ;;  %v1541_v40 = vld [vmem:[%s4613_s4 + $0x7f8] sm:$0xff]  ;;  %v2180_v59 = vld [vmem:[%s4616_s5 + $0x60] sm:$0xff]  ;;  %v2178_v49 = vld [vmem:[%s4616_s5 + $0x50] sm:$0xff] }
 0x2c7   :  { %2685 = vmatprep.subr.mxu1 %v1476_v37  ;;  %2031 = vmatmul.mubr.f32.vlgmr.msra.gmra.mxu0 %v1259_v4  ;;  %v4386_v39 = vmax.f32 %v1022_v43, %v1072_v18  ;;  %v1224_v37 = vrot.slane %v4244_v29, %v3231_v22  ;;  %v1524_v4 = vld [vmem:[%s4613_s4 + $0x770] sm:$0xff]  ;;  %v2173_v18 = vld [vmem:[%s4616_s5 + $0x28] sm:$0xff] }
 0x2c8   :  { %2686 = vmatpush3.msra.mxu1 %v1460_v10  ;;  %2159 = vrot.lane.b32.xlu0 %v2153_v32, %s2909_s10  ;;  %v2183_v32 = vld [vmem:[%s4616_s5 + $0x78] sm:$0xff]  ;;  %v2174_v33 = vld [vmem:[%s4616_s5 + $0x30] sm:$0xff] }
 0x2c9   :  { %2687 = vmatprep.subr.mxu1 %v1475_v51  ;;  %2155 = vrot.lane.b32.xlu1 %v2127_v46, %s2909_s10  ;;  %v1272_v63 = vrot.slane %v4386_v39, %v3258_v54  ;;  %v1237_v10 = vsel %vm895_vm8, %v1232_v1, %v1224_v37  ;;  %v1540_v51 = vld [vmem:[%s4613_s4 + $0x7f0] sm:$0xff]  ;;  %v1539_v54 = vld [vmem:[%s4613_s4 + $0x7e8] sm:$0xff]  ;;  %v1268_v26 = vrot.slane %v4386_v39, %v3231_v22  ;;  %v2176_v46 = vld [vmem:[%s4616_s5 + $0x40] sm:$0xff] }
 0x2ca   :  { %2688 = vmatpush3.msra.mxu1 %v1459_v41  ;;  %v1523_v41 = vld [vmem:[%s4613_s4 + $0x768] sm:$0xff]  ;;  %v2170_v43 = vld [vmem:[%s4616_s5 + $0x10] sm:$0xff] }
 0x2cb   :  { %2689 = vmatprep.subr.mxu1 %v1474_v7  ;;  %v1282_v29 = vsel %vm895_vm8, %v1280_v44, %v1272_v63  ;;  %v1538_v7 = vld [vmem:[%s4613_s4 + $0x7e0] sm:$0xff] }
 0x2cc   :  { %2690 = vmatpush3.msra.mxu1 %v1458_v9  ;;  %v1537_v9 = vld [vmem:[%s4613_s4 + $0x7d8] sm:$0xff] }
 0x2cd   :  { %2691 = vmatprep.subr.mxu1 %v1473_v50  ;;  %v1521_v50 = vld [vmem:[%s4613_s4 + $0x758] sm:$0xff] }
 0x2ce   :  { %2692 = vmatpush3.msra.mxu1 %v1457_v52  ;;  %v1536_v52 = vld [vmem:[%s4613_s4 + $0x7d0] sm:$0xff] }
 0x2cf   :  { %2693 = vmatprep.subr.mxu1 %v1472_v60  ;;  %v1520_v60 = vld [vmem:[%s4613_s4 + $0x750] sm:$0xff] }
 0x2d0   :  { %2694 = vmatpush3.msra.mxu1 %v1456_v61  ;;  %v1535_v61 = vld [vmem:[%s4613_s4 + $0x7c8] sm:$0xff] }
 0x2d1   :  { %2695 = vmatprep.subr.mxu1 %v1471_v57  ;;  %v1519_v57 = vld [vmem:[%s4613_s4 + $0x748] sm:$0xff] }
 0x2d2   :  { %2696 = vmatpush3.msra.mxu1 %v1455_v14  ;;  %v1533_v14 = vld [vmem:[%s4613_s4 + $0x7b8] sm:$0xff] }
 0x2d3   :  { %2697 = vmatprep.subr.mxu1 %v1470_v21  ;;  %v1516_v21 = vld [vmem:[%s4613_s4 + $0x730] sm:$0xff] }
 0x2d4   :  { %2698 = vmatpush3.msra.mxu1 %v1454_v56  ;;  %v1531_v56 = vld [vmem:[%s4613_s4 + $0x7a8] sm:$0xff] }
 0x2d5   :  { %2699 = vmatprep.subr.mxu1 %v1469_v16  ;;  %v1530_v16 = vld [vmem:[%s4613_s4 + $0x7a0] sm:$0xff] }
 0x2d6   :  { %2700 = vmatpush3.msra.mxu1 %v1453_v0  ;;  %v1529_v0 = vld [vmem:[%s4613_s4 + $0x798] sm:$0xff] }
 0x2d7   :  { %2701 = vmatprep.subr.mxu1 %v1468_v15  ;;  %v1512_v15 = vld [vmem:[%s4613_s4 + $0x710] sm:$0xff] }
 0x2d8   :  { %2702 = vmatpush3.msra.mxu1 %v1452_v25  ;;  %v1511_v25 = vld [vmem:[%s4613_s4 + $0x708] sm:$0xff] }
 0x2d9   :  { %2703 = vmatprep.subr.mxu1 %v1467_v47  ;;  %v1276_v47 = vrot.slane %v4378_v38, %v3231_v22  ;;  %v2181_v22 = vld [vmem:[%s4616_s5 + $0x68] sm:$0xff] }
 0x2da   :  { %2704 = vmatpush3.msra.mxu1 %v1451_v31  ;;  %v2169_v38 = vld [vmem:[%s4616_s5 + $0x8] sm:$0xff] }
 0x2db   :  { %2705 = vmatprep.subr.mxu1 %v1466_v3  ;;  %v1281_v31 = vsel %vm895_vm8, %v1276_v47, %v1268_v26  ;;  %v2910_v3 = vmov 0.0  }
 0x2dc   :  { %2706 = vmatpush3.msra.mxu1 %v1450_v20  ;;  %2815 = vmatprep.subr.mxu0 %v2910_v3  ;;  %v2179_v20 = vld [vmem:[%s4616_s5 + $0x58] sm:$0xff] }
 0x2dd   :  { %2707 = vmatprep.subr.mxu1 %v1465_v12  ;;  %2816 = vmatpush3.msra.mxu0 %v2183_v32  ;;  %v2177_v12 = vld [vmem:[%s4616_s5 + $0x48] sm:$0xff]  ;;  %v2279_v32 = vld [vmem:[%s4616_s5 + $0x98] sm:$0xff] }
 0x2de   :  { %2708 = vmatpush3.msra.mxu1 %v1449_v35  ;;  %2817 = vmatprep.subr.mxu0 %v2910_v3  ;;  %v2175_v35 = vld [vmem:[%s4616_s5 + $0x38] sm:$0xff] }
 0x2df   :  { %2709 = vmatprep.subr.mxu1 %v1464_v30  ;;  %2818 = vmatpush3.msra.mxu0 %v2182_v23  ;;  %v2172_v30 = vld [vmem:[%s4616_s5 + $0x20] sm:$0xff] }
 0x2e0   :  { %2710 = vmatpush3.msra.mxu1 %v1448_v28  ;;  %2819 = vmatprep.subr.mxu0 %v2910_v3  ;;  %v2171_v28 = vld [vmem:[%s4616_s5 + $0x18] sm:$0xff] }
 0x2e1   :  { %2711 = vmatprep.subr.mxu1 %v1463_v55  ;;  %2820 = vmatpush3.msra.mxu0 %v2181_v22  ;;  %v2168_v55 = vld [vmem:[%s4616_s5] sm:$0xff] }
 0x2e2   :  { %2712 = vmatpush3.msra.mxu1 %v1447_v5  ;;  %2821 = vmatprep.subr.mxu0 %v2910_v3 }
 0x2e3   :  { %2713 = vmatprep.subr.mxu1 %v1462_v34  ;;  %2822 = vmatpush3.msra.mxu0 %v2180_v59 }
 0x2e4   :  { %2714 = vmatpush3.msra.mxu1 %v1446_v42  ;;  %2823 = vmatprep.subr.mxu0 %v2910_v3 }
 0x2e5   :  { %1961 = vmatmul.mubr.f32.vlgmr.msra.gmra.mxu1 %v1237_v10  ;;  %2753 = vmatprep.subr.mxu1 %v1541_v40 }
 0x2e6   :  { %2754 = vmatpush3.msra.mxu1 %v1525_v36  ;;  %2100 = vmatprep.mubr.f32.mxu1 %v1282_v29  ;;  %v2899_v36 = vld [vmem:[%s4616_s5 + $0x81] ss:$0 sm:$0xff] }
 0x2e7   :  { %2755 = vmatprep.subr.mxu1 %v1540_v51  ;;  %2824 = vmatpush3.msra.mxu0 %v2179_v20 }
 0x2e8   :  { %2756 = vmatpush3.msra.mxu1 %v1524_v4  ;;  %2825 = vmatprep.subr.mxu0 %v2910_v3 }
 0x2e9   :  { %2757 = vmatprep.subr.mxu1 %v1539_v54  ;;  %2826 = vmatpush3.msra.mxu0 %v2178_v49 }
 0x2ea   :  { %2758 = vmatpush3.msra.mxu1 %v1523_v41  ;;  %2827 = vmatprep.subr.mxu0 %v2910_v3 }
 0x2eb   :  { %2759 = vmatprep.subr.mxu1 %v1538_v7  ;;  %2828 = vmatpush3.msra.mxu0 %v2177_v12 }
 0x2ec   :  { %2760 = vmatpush3.msra.mxu1 %v1522_v48  ;;  %2829 = vmatprep.subr.mxu0 %v2910_v3 }
 0x2ed   :  { %2761 = vmatprep.subr.mxu1 %v1537_v9  ;;  %2830 = vmatpush3.msra.mxu0 %v2176_v46  ;;  %v2278_v46 = vld [vmem:[%s4616_s5 + $0x90] sm:$0xff] }
 0x2ee   :  { %2762 = vmatpush3.msra.mxu1 %v1521_v50  ;;  %2831 = vmatprep.subr.mxu0 %v2910_v3 }
 0x2ef   :  { %2763 = vmatprep.subr.mxu1 %v1536_v52  ;;  %2832 = vmatpush3.msra.mxu0 %v2175_v35  ;;  %v2277_v35 = vld [vmem:[%s4616_s5 + $0x88] sm:$0xff] }
 0x2f0   :  { %2764 = vmatpush3.msra.mxu1 %v1520_v60  ;;  %2833 = vmatprep.subr.mxu0 %v2910_v3 }
 0x2f1   :  { %2765 = vmatprep.subr.mxu1 %v1535_v61  ;;  %2834 = vmatpush3.msra.mxu0 %v2174_v33 }
 0x2f2   :  { %2766 = vmatpush3.msra.mxu1 %v1519_v57  ;;  %2835 = vmatprep.subr.mxu0 %v2910_v3 }
 0x2f3   :  { %2767 = vmatprep.subr.mxu1 %v1534_v24  ;;  %2836 = vmatpush3.msra.mxu0 %v2173_v18 }
 0x2f4   :  { %2768 = vmatpush3.msra.mxu1 %v1518_v45  ;;  %2837 = vmatprep.subr.mxu0 %v2910_v3 }
 0x2f5   :  { %2769 = vmatprep.subr.mxu1 %v1533_v14  ;;  %2838 = vmatpush3.msra.mxu0 %v2172_v30 }
 0x2f6   :  { %2770 = vmatpush3.msra.mxu1 %v1517_v27  ;;  %2839 = vmatprep.subr.mxu0 %v2910_v3 }
 0x2f7   :  { %2771 = vmatprep.subr.mxu1 %v1532_v2  ;;  %2840 = vmatpush3.msra.mxu0 %v2171_v28 }
 0x2f8   :  { %2772 = vmatpush3.msra.mxu1 %v1516_v21  ;;  %2841 = vmatprep.subr.mxu0 %v2910_v3 }
 0x2f9   :  { %2773 = vmatprep.subr.mxu1 %v1531_v56  ;;  %2842 = vmatpush3.msra.mxu0 %v2170_v43 }
 0x2fa   :  { %2774 = vmatpush3.msra.mxu1 %v1515_v6  ;;  %2843 = vmatprep.subr.mxu0 %v2910_v3 }
 0x2fb   :  { %2775 = vmatprep.subr.mxu1 %v1530_v16  ;;  %2844 = vmatpush3.msra.mxu0 %v2169_v38 }
 0x2fc   :  { %2776 = vmatpush3.msra.mxu1 %v1514_v11  ;;  %2845 = vmatprep.subr.mxu0 %v2910_v3 }
 0x2fd   :  { %2777 = vmatprep.subr.mxu1 %v1529_v0  ;;  %2847 = vmatprep.mubr.msk.f32.mxu0 %vm2911_vm11, %v2910_v3 }
 0x2fe   :  { %2778 = vmatpush3.msra.mxu1 %v1513_v8  ;;  %2846 = vmatpush3.msra.mxu0 %v2168_v55 }
 0x2ff   :  { %2779 = vmatprep.subr.mxu1 %v1528_v13 }
 0x300   :  { %2780 = vmatpush3.msra.mxu1 %v1512_v15 }
 0x301   :  { %2781 = vmatprep.subr.mxu1 %v1527_v17 }
 0x302   :  { %2782 = vmatpush3.msra.mxu1 %v1511_v25  ;;  %v2503_v25 = vld [vmem:[%s4616_s5 + $0x80] ss:$0 sm:$0xff] }
 0x303   :  { %2783 = vmatprep.subr.mxu1 %v1526_v19 }
 0x304   :  { %2784 = vmatpush3.msra.mxu1 %v1510_v62 }
 0x305   :  { %2101 = vmatmul.mubr.f32.vlgmr.msra.gmra.mxu1 %v1281_v31  ;;  %2850 = vmatprep.subr.mxu1 %v2910_v3  ;;  %v2280_v31 = vld [vmem:[%s4616_s5 + $0xa0] sm:$0xff] }
 0x306   :  { %2858 = vmatprep.mubr.msk.f32.mxu1 %vm2911_vm11, %v2910_v3  ;;  %2851 = vmatpush3.msra.mxu1 %v2280_v31 }
 0x307   :  { %2852 = vmatprep.subr.mxu1 %v2910_v3 }
 0x308   :  { %2853 = vmatpush3.msra.mxu1 %v2279_v32 }
 0x309   :  { %2854 = vmatprep.subr.mxu1 %v2910_v3 }
 0x30a   :  { %2855 = vmatpush3.msra.mxu1 %v2278_v46 }
 0x30b   :  { %2856 = vmatprep.subr.mxu1 %v2910_v3 }
 0x30c   :  { %2857 = vmatpush3.msra.mxu1 %v2277_v35 }
 0x30d   :  { %2861 = vmatprep.subr.mxu1 %v2910_v3 }
 0x33a   :  { %v2160_v13 = vpop.permute.xlu0 %2159 }
 0x33b   :  { %v2156_v8 = vpop.permute.xlu1 %2155 }
 0x341   :  { %v2540_v5 = vpop.f32.mrf.mxu1 }
 0x343   :  { %v2541_v39 = vpop.f32.mrf.mxu1 }
 0x344   :  { %v2542_v42 = vadd.f32 %v2541_v39, %v2540_v5  ;;  %v2610_v44 = vpop.f32.mrf.mxu0 }
 0x346   :  { %v1613_v63 = vadd.f32 %v2899_v36, %v2542_v42  ;;  %v2611_v10 = vpop.f32.mrf.mxu0 }
 0x347   :  { %v2612_v41 = vadd.f32 %v2611_v10, %v2610_v44 }
 0x362   :  { %v2575_v34 = vpop.f32.mrf.mxu1 }
 0x364   :  { %v2576_v1 = vpop.f32.mrf.mxu1 }
 0x365   :  { %v2577_v40 = vadd.f32 %v2576_v1, %v2575_v34  ;;  %v2680_v4 = vpop.f32.mrf.mxu0 }
 0x367   :  { %v1683_v29 = vadd.f32 %v2577_v40, %v1613_v63  ;;  %v2681_v9 = vpop.f32.mrf.mxu0 }
 0x368   :  { %v2682_v61 = vadd.f32 %v2681_v9, %v2680_v4 }
 0x369   :  { %v1753_v48 = vadd.f32 %v2612_v41, %v1683_v29 }
 0x384   :  { %v2645_v37 = vpop.f32.mrf.mxu1 }
 0x386   :  { %v2646_v51 = vpop.f32.mrf.mxu1 }
 0x387   :  { %v2647_v7 = vadd.f32 %v2646_v51, %v2645_v37  ;;  %v2750_v60 = vpop.f32.mrf.mxu0 }
 0x389   :  { %v1823_v52 = vadd.f32 %v2647_v7, %v1753_v48  ;;  %v2751_v45 = vpop.f32.mrf.mxu0 }
 0x38a   :  { %v2752_v2 = vadd.f32 %v2751_v45, %v2750_v60 }
 0x38b   :  { %v1893_v24 = vadd.f32 %v2682_v61, %v1823_v52 }
 0x3a5   :  { %v2715_v54 = vpop.f32.mrf.mxu1 }
 0x3a7   :  { %v2716_v50 = vpop.f32.mrf.mxu1 }
 0x3a8   :  { %v2717_v57 = vadd.f32 %v2716_v50, %v2715_v54 }
 0x3aa   :  { %v1963_v14 = vadd.f32 %v2717_v57, %v1893_v24 }
 0x3ac   :  { %v2033_v56 = vadd.f32 %v2752_v2, %v1963_v14 }
 0x3c5   :  { %v2785_v27 = vpop.f32.mrf.mxu1 }
 0x3c7   :  { %v2786_v21 = vpop.f32.mrf.mxu1 }
 0x3c8   :  { %v2787_v6 = vadd.f32 %v2786_v21, %v2785_v27 }
 0x3ca   :  { %v2103_v16 = vadd.f32 %v2787_v6, %v2033_v56 }
 0x3cc   :  { %v2107_v11 = vmul.f32 0.01, %v2103_v16  ;;  %vm2106_vm12 = vcmp.gt.f32.partialorder %v2103_v16, 0.0 }
 0x3ce   :  { %v2108_v0 = vsel %vm2106_vm12, %v2103_v16, %v2107_v11 }
 0x3cf   :  { %v2163_v15 = vsel %vm2162_vm13, %v2108_v0, %v2156_v8 }
 0x3d0   :  { %v2165_v17 = vsel %vm2164_vm14, %v2163_v15, %v2160_v13 }
 0x3d1   :  { %2848 = vmatmul.mubr.msk.f32.vlgmr.msra.gmra.mxu0 %vm2166_vm15, %v2165_v17 }
 0x491   :  { %v2255_v19 = vpop.f32.mrf.mxu0 }
 0x492   :  { %v2256_v47 = vadd.f32 %v2503_v25, %v2255_v19 }
 0x493   :  { %v2849_v62 = vpop.f32.mrf.mxu0 }
 0x494   :  { %2891 = vtanh.f32 %v2256_v47  ;;  %v2505_v23 = vmul.f32 -1.442695, %v2256_v47 }
 0x496   :  { %2893 = vpow2.f32 %v2505_v23 }
 0x4a1   :  { %v2892_v26 = vpop.eup %2891 }
 0x4a2   :  { %2267 = vrot.lane.b32.xlu1 %v2892_v26, %s2909_s10 }
 0x4a3   :  { %v2894_v22 = vpop.eup %2893 }
 0x4a4   :  { %v2262_v59 = vadd.f32 1.0, %v2894_v22 }
 0x4a6   :  { %2895 = vrcp.f32 %v2262_v59 }
 0x4b3   :  { %v2896_v20 = vpop.eup %2895 }
 0x514   :  { %v2268_v49 = vpop.permute.xlu1 %2267 }
 0x515   :  { %v2270_v12 = vmul.f32 %v2896_v20, %v2268_v49 }
 0x517   :  { %2897 = vtanh.f32 %v2270_v12 }
 0x524   :  { %v2898_v33 = vpop.eup %2897 }
 0x525   :  { %2273 = vrot.lane.b32.xlu0 %v2898_v33, %s2912_s19 }
 0x529   :  { %2376 = vrot.lane.b32.xlu0 %v2280_v31, %s2912_s19 }
 0x52d   :  { %2374 = vrot.lane.b32.xlu0 %v2279_v32, %s2912_s19 }
 0x531   :  { %2370 = vrot.lane.b32.xlu0 %v2277_v35, %s2912_s19 }
 0x597   :  { %v2274_v18 = vpop.permute.xlu0 %2273 }
 0x598   :  { %v2276_v30 = vmul.f32 %v2896_v20, %v2274_v18 }
 0x59a   :  { %2463 = vrot.lane.b32.xlu0 %v2276_v30, %s2913_s20  ;;  %vm2281_vm0 = vcmp.gt.f32.partialorder %v2276_v30, 0.0  ;;  %v2282_v28 = vmul.f32 0.01, %v2276_v30 }
 0x59b   :  { %v2377_v38 = vpop.permute.xlu0 %2376 }
 0x59c   :  { %v2283_v43 = vsel %vm2281_vm0, %v2276_v30, %v2282_v28 }
 0x59d   :  { %2285 = vrot.lane.b32.xlu1 %v2283_v43, %s2914_s21 }
 0x59f   :  { %v2375_v5 = vpop.permute.xlu0 %2374 }
 0x5a1   :  { %2288 = vrot.lane.b32.xlu1 %v4311_v58, %s2912_s19 }
 0x5a3   :  { %v2371_v34 = vpop.permute.xlu0 %2370 }
 0x5a5   :  { %2372 = vrot.lane.b32.xlu1 %v2278_v46, %s2912_s19 }
 0x5a9   :  { %2383 = vrot.lane.b32.xlu1 %v4308_v53, %s2912_s19 }
 0x5ad   :  { %2467 = vrot.lane.b32.xlu1 %v2270_v12, %s2913_s20 }
 0x60c   :  { %v2464_v29 = vpop.permute.xlu0 %2463 }
 0x60f   :  { %v2286_v55 = vpop.permute.xlu1 %2285 }
 0x610   :  { %2859 = vmatmul.mubr.msk.f32.vlgmr.msra.gmra.mxu1 %vm2162_vm13, %v2286_v55 }
 0x611   :  { %2862 = vmatpush3.msra.mxu1 %v2377_v38  ;;  %2869 = vmatprep.mubr.msk.f32.mxu1 %vm2911_vm11, %v2910_v3 }
 0x612   :  { %2863 = vmatprep.subr.mxu1 %v2910_v3 }
 0x613   :  { %v2289_v39 = vpop.permute.xlu1 %2288  ;;  %2864 = vmatpush3.msra.mxu1 %v2375_v5 }
 0x614   :  { %2865 = vmatprep.subr.mxu1 %v2910_v3 }
 0x617   :  { %v2373_v58 = vpop.permute.xlu1 %2372 }
 0x618   :  { %2866 = vmatpush3.msra.mxu1 %v2373_v58 }
 0x619   :  { %2867 = vmatprep.subr.mxu1 %v2910_v3 }
 0x61a   :  { %2868 = vmatpush3.msra.mxu1 %v2371_v34 }
 0x61b   :  { %v2384_v40 = vpop.permute.xlu1 %2383 }
 0x61f   :  { %v2468_v3 = vpop.permute.xlu1 %2467 }
 0x6d0   :  { %v2359_v53 = vpop.f32.mrf.mxu1 }
 0x6d1   :  { %v2360_v1 = vadd.f32 %v2359_v53, %v2289_v39 }
 0x6d2   :  { %v2860_v42 = vpop.f32.mrf.mxu1 }
 0x6d3   :  { %vm2363_vm1 = vcmp.gt.f32.partialorder %v2360_v1, 0.0  ;;  %v2364_v44 = vmul.f32 0.01, %v2360_v1 }
 0x6d5   :  { %v2365_v37 = vsel %vm2363_vm1, %v2360_v1, %v2364_v44 }
 0x6d6   :  { %2870 = vmatmul.mubr.msk.f32.vlgmr.msra.gmra.mxu1 %vm2162_vm13, %v2365_v37 }
 0x796   :  { %v2455_v36 = vpop.f32.mrf.mxu1 }
 0x797   :  { %v2456_v63 = vadd.f32 %v2455_v36, %v2384_v40 }
 0x798   :  { %v2871_v10 = vpop.f32.mrf.mxu1 }
 0x799   :  { %vm2459_vm3 = vcmp.gt.f32.partialorder %v2456_v63, 0.0  ;;  %v2460_v51 = vmul.f32 0.01, %v2456_v63 }
 0x79b   :  { %v2461_v4 = vsel %vm2459_vm3, %v2456_v63, %v2460_v51 }
 0x79c   :  { %v2470_v54 = vsel %vm161_vm5, %v2461_v4, %v2464_v29 }
 0x79d   :  { %v2472_v41 = vsel %vm2471_vm4, %v2470_v54, %v2468_v3 }
 0x79e   :  { %v2474_v7 = vsel %vm2473_vm6, %v2472_v41, 0.0 }
 0x79f   :  { %2475 = vst [vmem:[%s4617_s6] sm:$0x3] %v2474_v7 }

</bundles_post_ra>
